<compile_context>
chip_gen: v7x
topology: tpu7x:2x2x1
jax: 0.10.0
libtpu: 0.0.40
codegen_flags: <defaults>
</compile_context>

<pallas_src>
import jax
import jax.numpy as jnp
from jax.experimental import pallas as pl
from jax.experimental.pallas import tpu as pltpu

GUMBEL_EPS = 1e-20


def _make_kernel(temperature, num_cats, num_gumbel_per_cat, half, Ce, Cout):
    G = num_cats * num_gumbel_per_cat
    npc = num_gumbel_per_cat
    inv_temp = float(1.0 / temperature)   # fold 1/T into a constant multiply

    def kernel(x_ref, g_ref, eps_ref,
               we_ref, be_ref, wdg_ref, wdn_ref, bd_ref,
               out_ref):
        TB, N, Cin = x_ref.shape
        rows = TB * N

        # ---- fused Sn-equivariant encoder (bf16 MXU operands, f32 acc) ----
        # enc = x @ W1 + mean_n(x) @ W2 + b == (x@[W1|W2])[:, :Ce]
        #       + mean_n((x@[W1|W2])[:, Ce:]) + b
        x2 = x_ref[...].reshape(rows, Cin).astype(jnp.bfloat16)
        xW = jnp.dot(x2, we_ref[...], preferred_element_type=jnp.float32)   # (rows, 2*Ce)
        xW3 = xW.reshape(TB, N, 2 * Ce)
        enc3 = (xW3[:, :, :Ce]
                + jnp.mean(xW3[:, :, Ce:], axis=1, keepdims=True)
                + be_ref[...])                                              # (TB, N, Ce)
        enc = enc3.reshape(rows, Ce)

        # ---- Gumbel-softmax + plain softmax, per category -----------------
        # Per-category max stabilization (robust: no cross-category underflow
        # can zero a denominator).  num_cats is a small compile-time constant.
        logits = enc[:, :G]                                                 # (rows, G)
        g = g_ref[...].reshape(rows, G)                                     # precomputed Gumbel noise
        xg_parts = []
        pi_parts = []
        for c in range(num_cats):
            lo = c * npc
            lg_c = logits[:, lo:lo + npc]
            y_c = (lg_c + g[:, lo:lo + npc]) * inv_temp
            y_c = y_c - jnp.max(y_c, axis=-1, keepdims=True)
            e_c = jnp.exp(y_c)
            xg_parts.append(
                e_c * pl.reciprocal(jnp.sum(e_c, axis=-1, keepdims=True), approx=True))
            l_c = lg_c - jnp.max(lg_c, axis=-1, keepdims=True)
            p_c = jnp.exp(l_c)
            pi_parts.append(
                p_c * pl.reciprocal(jnp.sum(p_c, axis=-1, keepdims=True), approx=True))
        x_gbl = jnp.concatenate(xg_parts, axis=-1) if num_cats > 1 else xg_parts[0]
        pis = jnp.concatenate(pi_parts, axis=-1) if num_cats > 1 else pi_parts[0]

        # ---- Gaussian reparameterization on the remaining channels --------
        log_var = enc[:, G:G + half]
        z_mu = enc[:, G + half:G + 2 * half]
        std = jnp.exp(log_var * 0.5)
        x_gauss = eps_ref[...].reshape(rows, half) * std + z_mu

        # ---- fused Sn-equivariant decoder (split contraction: no lane
        #      concat of [x_gbl, x_gauss]; bf16 MXU operands) ---------------
        dW = (jnp.dot(x_gbl.astype(jnp.bfloat16), wdg_ref[...],
                      preferred_element_type=jnp.float32)
              + jnp.dot(x_gauss.astype(jnp.bfloat16), wdn_ref[...],
                        preferred_element_type=jnp.float32))               # (rows, 2*Cout)
        dW3 = dW.reshape(TB, N, 2 * Cout)
        pred3 = (dW3[:, :, :Cout]
                 + jnp.mean(dW3[:, :, Cout:], axis=1, keepdims=True)
                 + bd_ref[...])                                             # (TB, N, Cout)

        # ---- single lane-dense full-block store ----------------------------
        slab = jnp.concatenate(
            [pred3,
             z_mu.reshape(TB, N, half),
             log_var.reshape(TB, N, half),
             pis.reshape(TB, N, G)],
            axis=-1)
        out_ref[...] = slab

    return kernel


def _vmem_limit_bytes():
    """~3/4 of physical VMEM, capped: 48 MiB on v7x, ~96 MiB on v5e/v6e."""
    cap = 64 * 1024 * 1024
    try:
        cap = int(pltpu.get_tpu_info().vmem_capacity_bytes)
    except Exception:
        pass
    return min((cap * 3) // 4, 110 * 1024 * 1024)


def _auto_batch_tile(B, N, Cin, G, half, Ce, Cout, Ctot, vmem_limit):
    """Pick TB so rows=TB*N is large (MXU-filling) but the per-step footprint
    (double-buffered I/O blocks + in-kernel f32 intermediates) fits VMEM."""
    io_bytes_per_row = 4 * (Cin + G + half + Ctot) * 2          # double-buffered in+out
    interm_bytes_per_row = 4 * (2 * Ce + Ce + 3 * G + 2 * half + 2 * Cout + Ctot)
    per_row = max(1, io_bytes_per_row + interm_bytes_per_row)
    budget = int(vmem_limit * 0.6)
    max_rows = max(N, budget // per_row)
    target_rows = min(4096, max_rows)
    TB = max(1, target_rows // N)
    # Round rows down to a multiple of 256 when cheap to do so.
    if 256 % N == 0:
        chunk = 256 // N
        if TB > chunk:
            TB = (TB // chunk) * chunk
    TB = min(TB, B)
    # Keep >= 2 grid steps so the "parallel" batch axis feeds both v7x TCs.
    if TB >= B and B >= 2:
        TB = (B + 1) // 2
    return max(1, TB)


def sn_channel_bool_vae_forward(x, u_gumbel, eps_normal, params, *,
                                temperature, num_cats, num_gumbel_per_cat,
                                batch_tile=None):
    """Runs the VAE forward pass.  Returns (predict, z_mu, log_var, softmax(log_pis))."""
    we1, we2, be, wd1, wd2, bd = params
    B, N, Cin = x.shape
    Ce = we1.shape[1]
    G = num_cats * num_gumbel_per_cat
    n_gauss = Ce - G
    assert n_gauss % 2 == 0, "Number of channels is not even!"
    half = n_gauss // 2
    Cout = wd1.shape[1]
    Clat = G + half
    assert wd1.shape[0] == Clat and wd2.shape[0] == Clat
    Ctot = Cout + 2 * half + G

    # Fused weights, built once in the wrapper; bf16 MXU operands.
    we_cat = jnp.concatenate([we1, we2], axis=1).astype(jnp.bfloat16)   # (Cin, 2*Ce)
    wd_cat = jnp.concatenate([wd1, wd2], axis=1)                        # (Clat, 2*Cout)
    wd_gbl = wd_cat[:G].astype(jnp.bfloat16)                            # (G,    2*Cout)
    wd_gauss = wd_cat[G:].astype(jnp.bfloat16)                          # (half, 2*Cout)
    be = be.astype(jnp.float32)
    bd = bd.astype(jnp.float32)

    # Gumbel noise precomputed in the wrapper (removes the in-kernel logs).
    gumbel = (-jnp.log(-jnp.log(u_gumbel + GUMBEL_EPS) + GUMBEL_EPS)).astype(jnp.float32)
    x = x.astype(jnp.float32)
    eps_normal = eps_normal.astype(jnp.float32)

    vmem_limit = _vmem_limit_bytes()
    TB = batch_tile if batch_tile is not None else _auto_batch_tile(
        B, N, Cin, G, half, Ce, Cout, Ctot, vmem_limit)
    TB = max(1, min(TB, B))
    num_tiles = (B + TB - 1) // TB
    Bp = num_tiles * TB
    if Bp != B:
        pad = Bp - B
        x = jnp.pad(x, ((0, pad), (0, 0), (0, 0)))
        gumbel = jnp.pad(gumbel, ((0, pad), (0, 0), (0, 0)))
        eps_normal = jnp.pad(eps_normal, ((0, pad), (0, 0), (0, 0)))

    kernel = _make_kernel(temperature, num_cats, num_gumbel_per_cat, half, Ce, Cout)

    def tile_spec(c):
        return pl.BlockSpec((TB, N, c), lambda b: (b, 0, 0))

    def const_spec(shape):
        # Constant index map -> block stays VMEM-resident across grid steps.
        nd = len(shape)
        return pl.BlockSpec(tuple(shape), lambda b, _nd=nd: (0,) * _nd)

    out = pl.pallas_call(
        kernel,
        out_shape=jax.ShapeDtypeStruct((Bp, N, Ctot), jnp.float32),
        grid_spec=pltpu.PrefetchScalarGridSpec(
            num_scalar_prefetch=0,
            grid=(num_tiles,),
            in_specs=[
                tile_spec(Cin),                  # x
                tile_spec(G),                    # precomputed Gumbel noise
                tile_spec(half),                 # normal eps
                const_spec(we_cat.shape), const_spec(be.shape),
                const_spec(wd_gbl.shape), const_spec(wd_gauss.shape),
                const_spec(bd.shape),
            ],
            out_specs=tile_spec(Ctot),
        ),
        compiler_params=pltpu.CompilerParams(
            dimension_semantics=("parallel",),        # shard tiles across TCs
            vmem_limit_bytes=vmem_limit,
        ),
    )(x, gumbel, eps_normal, we_cat, be, wd_gbl, wd_gauss, bd)

    out = out[:B]
    predict = out[..., :Cout]
    z_mu = out[..., Cout:Cout + half]
    log_var = out[..., Cout + half:Cout + 2 * half]
    pis = out[..., Cout + 2 * half:]
    return predict, z_mu, log_var, pis


def reference_forward(x, u_gumbel, eps_normal, params, *,
                      temperature, num_cats, num_gumbel_per_cat):
    """Pure-JAX f32 reference mirroring the PyTorch forward semantics."""
    we1, we2, be, wd1, wd2, bd = params
    G = num_cats * num_gumbel_per_cat

    enc = x @ we1 + jnp.mean(x, axis=1, keepdims=True) @ we2 + be
    log_pis = enc[..., :G]
    old_shape = log_pis.shape
    log_pis_r = log_pis.reshape(old_shape[:-1] + (num_cats, num_gumbel_per_cat))

    gumbel = -jnp.log(-jnp.log(
        u_gumbel.reshape(log_pis_r.shape) + GUMBEL_EPS) + GUMBEL_EPS)
    y = (log_pis_r + gumbel) / temperature
    x_gbl = jax.nn.softmax(y, axis=-1).reshape(old_shape)

    other = enc[..., G:]
    half = other.shape[-1] // 2
    log_var = other[..., :half]
    z_mu = other[..., half:]
    std = jnp.exp(log_var / 2.0)
    x_gauss = eps_normal * std + z_mu

    x_sample = jnp.concatenate([x_gbl, x_gauss], axis=-1)
    predict = (x_sample @ wd1
               + jnp.mean(x_sample, axis=1, keepdims=True) @ wd2 + bd)
    pis = jax.nn.softmax(log_pis_r, axis=-1).reshape(old_shape)
    return predict, z_mu, log_var, pis


if __name__ == "__main__":
    # Small but representative shapes: multi-tile grid + batch padding,
    # N a multiple of 8 so in-kernel reshapes stay sublane-aligned.
    B, N, Cin = 11, 8, 4
    num_cats, num_gumbel_per_cat = 2, 4
    G = num_cats * num_gumbel_per_cat          # 8 gumbel channels
    half = 4                                   # gaussian latent size
    Ce = G + 2 * half                          # encoder output channels = 16
    Clat = G + half                            # decoder input channels  = 12
    Cout = Cin                                 # reconstruct input channels
    temperature = 0.5

    key = jax.random.PRNGKey(0)
    keys = jax.random.split(key, 9)
    x = jax.random.normal(keys[0], (B, N, Cin), jnp.float32)
    u_gumbel = jax.random.uniform(keys[1], (B, N, G), jnp.float32,
                                  minval=1e-6, maxval=1.0 - 1e-6)
    eps_normal = jax.random.normal(keys[2], (B, N, half), jnp.float32)

    def init(k, shape, scale=0.3):
        return scale * jax.random.normal(k, shape, jnp.float32)

    params = (
        init(keys[3], (Cin, Ce)),     # encoder W1
        init(keys[4], (Cin, Ce)),     # encoder W2 (pooled term)
        init(keys[5], (1, Ce)),       # encoder bias
        init(keys[6], (Clat, Cout)),  # decoder W1
        init(keys[7], (Clat, Cout)),  # decoder W2 (pooled term)
        init(keys[8], (1, Cout)),     # decoder bias
    )

    outs = sn_channel_bool_vae_forward(
        x, u_gumbel, eps_normal, params,
        temperature=temperature, num_cats=num_cats,
        num_gumbel_per_cat=num_gumbel_per_cat)
    outs = jax.block_until_ready(outs)

    refs = reference_forward(
        x, u_gumbel, eps_normal, params,
        temperature=temperature, num_cats=num_cats,
        num_gumbel_per_cat=num_gumbel_per_cat)

    # Tolerance deliberately relaxed vs. the pure-f32 version: the kernel uses
    # bf16 MXU operands + approximate EUP reciprocals (per perf review).
    for o, r in zip(outs, refs):
        assert o.shape == r.shape and o.dtype == r.dtype
        assert jnp.allclose(o, r, atol=5e-2, rtol=5e-2), \
            f"mismatch: max err {jnp.max(jnp.abs(o - r))}"
        assert not jnp.any(jnp.isnan(o))

    print("KERNEL_OK")
</pallas_src>

<mosaic_0001>
module attributes {stable_mosaic.version = 11 : i64} {
  func.func @kernel(%arg0: i32, %arg1: memref<6x8x4xf32, #tpu.memory_space<vmem>>, %arg2: memref<6x8x8xf32, #tpu.memory_space<vmem>>, %arg3: memref<6x8x4xf32, #tpu.memory_space<vmem>>, %arg4: memref<4x32xbf16, #tpu.memory_space<vmem>>, %arg5: memref<1x16xf32, #tpu.memory_space<vmem>>, %arg6: memref<8x8xbf16, #tpu.memory_space<vmem>>, %arg7: memref<4x8xbf16, #tpu.memory_space<vmem>>, %arg8: memref<1x4xf32, #tpu.memory_space<vmem>>, %arg9: memref<6x8x20xf32, #tpu.memory_space<vmem>>) attributes {dimension_semantics = [#tpu.dimension_semantics<parallel>], iteration_bounds = array<i64: 2>, scalar_prefetch = 0 : i64, scratch_operands = 0 : i64, tpu.core_type = #tpu.core_type<tc>, window_params = [{transform_indices = @transform_0, window_bounds = array<i64: 6, 8, 4>}, {transform_indices = @transform_1, window_bounds = array<i64: 6, 8, 8>}, {transform_indices = @transform_2, window_bounds = array<i64: 6, 8, 4>}, {pipeline_mode = #tpu.pipeline_mode<synchronous>, transform_indices = @transform_3, window_bounds = array<i64: 4, 32>}, {pipeline_mode = #tpu.pipeline_mode<synchronous>, transform_indices = @transform_4, window_bounds = array<i64: 1, 16>}, {pipeline_mode = #tpu.pipeline_mode<synchronous>, transform_indices = @transform_5, window_bounds = array<i64: 8, 8>}, {pipeline_mode = #tpu.pipeline_mode<synchronous>, transform_indices = @transform_6, window_bounds = array<i64: 4, 8>}, {pipeline_mode = #tpu.pipeline_mode<synchronous>, transform_indices = @transform_7, window_bounds = array<i64: 1, 4>}, {transform_indices = @transform_8, window_bounds = array<i64: 6, 8, 20>}]} {
    %c0 = arith.constant 0 : index
    %c0_0 = arith.constant 0 : index
    %c0_1 = arith.constant 0 : index
    %0 = vector.load %arg1[%c0, %c0_0, %c0_1] : memref<6x8x4xf32, #tpu.memory_space<vmem>>, vector<6x8x4xf32>
    %1 = vector.shape_cast %0 : vector<6x8x4xf32> to vector<48x4xf32>
    %2 = arith.truncf %1 : vector<48x4xf32> to vector<48x4xbf16>
    %c0_2 = arith.constant 0 : index
    %c0_3 = arith.constant 0 : index
    %3 = vector.load %arg4[%c0_2, %c0_3] : memref<4x32xbf16, #tpu.memory_space<vmem>>, vector<4x32xbf16>
    %cst = arith.constant dense<0.000000e+00> : vector<48x32xf32>
    %4 = tpu.matmul %2, %3, %cst {dimension_numbers = #tpu.dot_dimension_numbers<[1], [0], [0], [1], [0, 0, 1, 1], [], []>} : vector<48x4xbf16>, vector<4x32xbf16>, vector<48x32xf32> -> vector<48x32xf32>
    %5 = vector.shape_cast %4 : vector<48x32xf32> to vector<6x8x32xf32>
    %6 = vector.extract_strided_slice %5 {offsets = [0, 0, 0], sizes = [6, 8, 16], strides = [1, 1, 1]} : vector<6x8x32xf32> to vector<6x8x16xf32>
    %7 = vector.extract_strided_slice %5 {offsets = [0, 0, 16], sizes = [6, 8, 16], strides = [1, 1, 1]} : vector<6x8x32xf32> to vector<6x8x16xf32>
    %cst_4 = arith.constant dense<0.000000e+00> : vector<6x16xf32>
    %8 = vector.multi_reduction <add>, %7, %cst_4 [1] : vector<6x8x16xf32> to vector<6x16xf32>
    %9 = vector.shape_cast %8 : vector<6x16xf32> to vector<6x1x16xf32>
    %cst_5 = arith.constant 8.000000e+00 : f32
    %10 = vector.broadcast %cst_5 : f32 to vector<6x1x16xf32>
    %11 = arith.divf %9, %10 : vector<6x1x16xf32>
    %12 = vector.broadcast %11 : vector<6x1x16xf32> to vector<6x8x16xf32>
    %13 = arith.addf %6, %12 : vector<6x8x16xf32>
    %c0_6 = arith.constant 0 : index
    %c0_7 = arith.constant 0 : index
    %14 = vector.load %arg5[%c0_6, %c0_7] : memref<1x16xf32, #tpu.memory_space<vmem>>, vector<1x16xf32>
    %15 = vector.shape_cast %14 : vector<1x16xf32> to vector<1x1x16xf32>
    %16 = vector.broadcast %15 : vector<1x1x16xf32> to vector<6x8x16xf32>
    %17 = arith.addf %13, %16 : vector<6x8x16xf32>
    %18 = vector.shape_cast %17 : vector<6x8x16xf32> to vector<48x16xf32>
    %19 = vector.extract_strided_slice %18 {offsets = [0, 0], sizes = [48, 8], strides = [1, 1]} : vector<48x16xf32> to vector<48x8xf32>
    %c0_8 = arith.constant 0 : index
    %c0_9 = arith.constant 0 : index
    %c0_10 = arith.constant 0 : index
    %20 = vector.load %arg2[%c0_8, %c0_9, %c0_10] : memref<6x8x8xf32, #tpu.memory_space<vmem>>, vector<6x8x8xf32>
    %21 = vector.shape_cast %20 : vector<6x8x8xf32> to vector<48x8xf32>
    %22 = vector.extract_strided_slice %19 {offsets = [0, 0], sizes = [48, 4], strides = [1, 1]} : vector<48x8xf32> to vector<48x4xf32>
    %23 = vector.extract_strided_slice %21 {offsets = [0, 0], sizes = [48, 4], strides = [1, 1]} : vector<48x8xf32> to vector<48x4xf32>
    %24 = arith.addf %22, %23 : vector<48x4xf32>
    %cst_11 = arith.constant 2.000000e+00 : f32
    %25 = vector.broadcast %cst_11 : f32 to vector<48x4xf32>
    %26 = arith.mulf %24, %25 : vector<48x4xf32>
    %cst_12 = arith.constant dense<0xFF800000> : vector<48xf32>
    %27 = vector.multi_reduction <maximumf>, %26, %cst_12 [1] : vector<48x4xf32> to vector<48xf32>
    %28 = vector.shape_cast %27 : vector<48xf32> to vector<48x1xf32>
    %29 = vector.broadcast %28 : vector<48x1xf32> to vector<48x4xf32>
    %30 = arith.subf %26, %29 : vector<48x4xf32>
    %31 = math.exp %30 : vector<48x4xf32>
    %cst_13 = arith.constant dense<0.000000e+00> : vector<48xf32>
    %32 = vector.multi_reduction <add>, %31, %cst_13 [1] : vector<48x4xf32> to vector<48xf32>
    %33 = vector.shape_cast %32 : vector<48xf32> to vector<48x1xf32>
    %34 = tpu.reciprocal %33 {approx = true} : vector<48x1xf32> -> vector<48x1xf32>
    %35 = vector.broadcast %34 : vector<48x1xf32> to vector<48x4xf32>
    %36 = arith.mulf %31, %35 : vector<48x4xf32>
    %cst_14 = arith.constant dense<0xFF800000> : vector<48xf32>
    %37 = vector.multi_reduction <maximumf>, %22, %cst_14 [1] : vector<48x4xf32> to vector<48xf32>
    %38 = vector.shape_cast %37 : vector<48xf32> to vector<48x1xf32>
    %39 = vector.broadcast %38 : vector<48x1xf32> to vector<48x4xf32>
    %40 = arith.subf %22, %39 : vector<48x4xf32>
    %41 = math.exp %40 : vector<48x4xf32>
    %cst_15 = arith.constant dense<0.000000e+00> : vector<48xf32>
    %42 = vector.multi_reduction <add>, %41, %cst_15 [1] : vector<48x4xf32> to vector<48xf32>
    %43 = vector.shape_cast %42 : vector<48xf32> to vector<48x1xf32>
    %44 = tpu.reciprocal %43 {approx = true} : vector<48x1xf32> -> vector<48x1xf32>
    %45 = vector.broadcast %44 : vector<48x1xf32> to vector<48x4xf32>
    %46 = arith.mulf %41, %45 : vector<48x4xf32>
    %47 = vector.extract_strided_slice %19 {offsets = [0, 4], sizes = [48, 4], strides = [1, 1]} : vector<48x8xf32> to vector<48x4xf32>
    %48 = vector.extract_strided_slice %21 {offsets = [0, 4], sizes = [48, 4], strides = [1, 1]} : vector<48x8xf32> to vector<48x4xf32>
    %49 = arith.addf %47, %48 : vector<48x4xf32>
    %cst_16 = arith.constant 2.000000e+00 : f32
    %50 = vector.broadcast %cst_16 : f32 to vector<48x4xf32>
    %51 = arith.mulf %49, %50 : vector<48x4xf32>
    %cst_17 = arith.constant dense<0xFF800000> : vector<48xf32>
    %52 = vector.multi_reduction <maximumf>, %51, %cst_17 [1] : vector<48x4xf32> to vector<48xf32>
    %53 = vector.shape_cast %52 : vector<48xf32> to vector<48x1xf32>
    %54 = vector.broadcast %53 : vector<48x1xf32> to vector<48x4xf32>
    %55 = arith.subf %51, %54 : vector<48x4xf32>
    %56 = math.exp %55 : vector<48x4xf32>
    %cst_18 = arith.constant dense<0.000000e+00> : vector<48xf32>
    %57 = vector.multi_reduction <add>, %56, %cst_18 [1] : vector<48x4xf32> to vector<48xf32>
    %58 = vector.shape_cast %57 : vector<48xf32> to vector<48x1xf32>
    %59 = tpu.reciprocal %58 {approx = true} : vector<48x1xf32> -> vector<48x1xf32>
    %60 = vector.broadcast %59 : vector<48x1xf32> to vector<48x4xf32>
    %61 = arith.mulf %56, %60 : vector<48x4xf32>
    %cst_19 = arith.constant dense<0xFF800000> : vector<48xf32>
    %62 = vector.multi_reduction <maximumf>, %47, %cst_19 [1] : vector<48x4xf32> to vector<48xf32>
    %63 = vector.shape_cast %62 : vector<48xf32> to vector<48x1xf32>
    %64 = vector.broadcast %63 : vector<48x1xf32> to vector<48x4xf32>
    %65 = arith.subf %47, %64 : vector<48x4xf32>
    %66 = math.exp %65 : vector<48x4xf32>
    %cst_20 = arith.constant dense<0.000000e+00> : vector<48xf32>
    %67 = vector.multi_reduction <add>, %66, %cst_20 [1] : vector<48x4xf32> to vector<48xf32>
    %68 = vector.shape_cast %67 : vector<48xf32> to vector<48x1xf32>
    %69 = tpu.reciprocal %68 {approx = true} : vector<48x1xf32> -> vector<48x1xf32>
    %70 = vector.broadcast %69 : vector<48x1xf32> to vector<48x4xf32>
    %71 = arith.mulf %66, %70 : vector<48x4xf32>
    %72 = tpu.concatenate %36, %61 in 1 : vector<48x4xf32>, vector<48x4xf32> -> vector<48x8xf32>
    %73 = tpu.concatenate %46, %71 in 1 : vector<48x4xf32>, vector<48x4xf32> -> vector<48x8xf32>
    %74 = vector.extract_strided_slice %18 {offsets = [0, 8], sizes = [48, 4], strides = [1, 1]} : vector<48x16xf32> to vector<48x4xf32>
    %75 = vector.extract_strided_slice %18 {offsets = [0, 12], sizes = [48, 4], strides = [1, 1]} : vector<48x16xf32> to vector<48x4xf32>
    %cst_21 = arith.constant 5.000000e-01 : f32
    %76 = vector.broadcast %cst_21 : f32 to vector<48x4xf32>
    %77 = arith.mulf %74, %76 : vector<48x4xf32>
    %78 = math.exp %77 : vector<48x4xf32>
    %c0_22 = arith.constant 0 : index
    %c0_23 = arith.constant 0 : index
    %c0_24 = arith.constant 0 : index
    %79 = vector.load %arg3[%c0_22, %c0_23, %c0_24] : memref<6x8x4xf32, #tpu.memory_space<vmem>>, vector<6x8x4xf32>
    %80 = vector.shape_cast %79 : vector<6x8x4xf32> to vector<48x4xf32>
    %81 = arith.mulf %80, %78 : vector<48x4xf32>
    %82 = arith.addf %81, %75 : vector<48x4xf32>
    %83 = arith.truncf %72 : vector<48x8xf32> to vector<48x8xbf16>
    %c0_25 = arith.constant 0 : index
    %c0_26 = arith.constant 0 : index
    %84 = vector.load %arg6[%c0_25, %c0_26] : memref<8x8xbf16, #tpu.memory_space<vmem>>, vector<8x8xbf16>
    %cst_27 = arith.constant dense<0.000000e+00> : vector<48x8xf32>
    %85 = tpu.matmul %83, %84, %cst_27 {dimension_numbers = #tpu.dot_dimension_numbers<[1], [0], [0], [1], [0, 0, 1, 1], [], []>} : vector<48x8xbf16>, vector<8x8xbf16>, vector<48x8xf32> -> vector<48x8xf32>
    %86 = arith.truncf %82 : vector<48x4xf32> to vector<48x4xbf16>
    %c0_28 = arith.constant 0 : index
    %c0_29 = arith.constant 0 : index
    %87 = vector.load %arg7[%c0_28, %c0_29] : memref<4x8xbf16, #tpu.memory_space<vmem>>, vector<4x8xbf16>
    %cst_30 = arith.constant dense<0.000000e+00> : vector<48x8xf32>
    %88 = tpu.matmul %86, %87, %cst_30 {dimension_numbers = #tpu.dot_dimension_numbers<[1], [0], [0], [1], [0, 0, 1, 1], [], []>} : vector<48x4xbf16>, vector<4x8xbf16>, vector<48x8xf32> -> vector<48x8xf32>
    %89 = arith.addf %85, %88 : vector<48x8xf32>
    %90 = vector.shape_cast %89 : vector<48x8xf32> to vector<6x8x8xf32>
    %91 = vector.extract_strided_slice %90 {offsets = [0, 0, 0], sizes = [6, 8, 4], strides = [1, 1, 1]} : vector<6x8x8xf32> to vector<6x8x4xf32>
    %92 = vector.extract_strided_slice %90 {offsets = [0, 0, 4], sizes = [6, 8, 4], strides = [1, 1, 1]} : vector<6x8x8xf32> to vector<6x8x4xf32>
    %cst_31 = arith.constant dense<0.000000e+00> : vector<6x4xf32>
    %93 = vector.multi_reduction <add>, %92, %cst_31 [1] : vector<6x8x4xf32> to vector<6x4xf32>
    %94 = vector.shape_cast %93 : vector<6x4xf32> to vector<6x1x4xf32>
    %cst_32 = arith.constant 8.000000e+00 : f32
    %95 = vector.broadcast %cst_32 : f32 to vector<6x1x4xf32>
    %96 = arith.divf %94, %95 : vector<6x1x4xf32>
    %97 = vector.broadcast %96 : vector<6x1x4xf32> to vector<6x8x4xf32>
    %98 = arith.addf %91, %97 : vector<6x8x4xf32>
    %c0_33 = arith.constant 0 : index
    %c0_34 = arith.constant 0 : index
    %99 = vector.load %arg8[%c0_33, %c0_34] : memref<1x4xf32, #tpu.memory_space<vmem>>, vector<1x4xf32>
    %100 = vector.shape_cast %99 : vector<1x4xf32> to vector<1x1x4xf32>
    %101 = vector.broadcast %100 : vector<1x1x4xf32> to vector<6x8x4xf32>
    %102 = arith.addf %98, %101 : vector<6x8x4xf32>
    %103 = vector.shape_cast %75 : vector<48x4xf32> to vector<6x8x4xf32>
    %104 = vector.shape_cast %74 : vector<48x4xf32> to vector<6x8x4xf32>
    %105 = vector.shape_cast %73 : vector<48x8xf32> to vector<6x8x8xf32>
    %106 = tpu.concatenate %102, %103, %104, %105 in 2 : vector<6x8x4xf32>, vector<6x8x4xf32>, vector<6x8x4xf32>, vector<6x8x8xf32> -> vector<6x8x20xf32>
    %c0_35 = arith.constant 0 : index
    %c0_36 = arith.constant 0 : index
    %c0_37 = arith.constant 0 : index
    %107 = vector.load %arg9[%c0_35, %c0_36, %c0_37] : memref<6x8x20xf32, #tpu.memory_space<vmem>>, vector<6x8x20xf32>
    tpu.vector_store %arg9[%c0_35, %c0_36, %c0_37], %106 {strides = array<i32>} : memref<6x8x20xf32, #tpu.memory_space<vmem>>, vector<6x8x20xf32>,
    return
  }
  func.func @transform_0(%arg0: i32) -> (i32, i32, i32) {
    %c0_i32 = arith.constant 0 : i32
    %c0_i32_0 = arith.constant 0 : i32
    %c0_i32_1 = arith.constant 0 : i32
    return %arg0, %c0_i32, %c0_i32_0 : i32, i32, i32
  }
  func.func @transform_1(%arg0: i32) -> (i32, i32, i32) {
    %c0_i32 = arith.constant 0 : i32
    %c0_i32_0 = arith.constant 0 : i32
    %c0_i32_1 = arith.constant 0 : i32
    return %arg0, %c0_i32, %c0_i32_0 : i32, i32, i32
  }
  func.func @transform_2(%arg0: i32) -> (i32, i32, i32) {
    %c0_i32 = arith.constant 0 : i32
    %c0_i32_0 = arith.constant 0 : i32
    %c0_i32_1 = arith.constant 0 : i32
    return %arg0, %c0_i32, %c0_i32_0 : i32, i32, i32
  }
  func.func @transform_3(%arg0: i32) -> (i32, i32) {
    %c0_i32 = arith.constant 0 : i32
    %c0_i32_0 = arith.constant 0 : i32
    %c0_i32_1 = arith.constant 0 : i32
    return %c0_i32, %c0_i32_0 : i32, i32
  }
  func.func @transform_4(%arg0: i32) -> (i32, i32) {
    %c0_i32 = arith.constant 0 : i32
    %c0_i32_0 = arith.constant 0 : i32
    %c0_i32_1 = arith.constant 0 : i32
    return %c0_i32, %c0_i32_0 : i32, i32
  }
  func.func @transform_5(%arg0: i32) -> (i32, i32) {
    %c0_i32 = arith.constant 0 : i32
    %c0_i32_0 = arith.constant 0 : i32
    %c0_i32_1 = arith.constant 0 : i32
    return %c0_i32, %c0_i32_0 : i32, i32
  }
  func.func @transform_6(%arg0: i32) -> (i32, i32) {
    %c0_i32 = arith.constant 0 : i32
    %c0_i32_0 = arith.constant 0 : i32
    %c0_i32_1 = arith.constant 0 : i32
    return %c0_i32, %c0_i32_0 : i32, i32
  }
  func.func @transform_7(%arg0: i32) -> (i32, i32) {
    %c0_i32 = arith.constant 0 : i32
    %c0_i32_0 = arith.constant 0 : i32
    %c0_i32_1 = arith.constant 0 : i32
    return %c0_i32, %c0_i32_0 : i32, i32
  }
  func.func @transform_8(%arg0: i32) -> (i32, i32, i32) {
    %c0_i32 = arith.constant 0 : i32
    %c0_i32_0 = arith.constant 0 : i32
    %c0_i32_1 = arith.constant 0 : i32
    return %arg0, %c0_i32, %c0_i32_0 : i32, i32, i32
  }
}

</mosaic_0001>

<bundles_post_ra>
// kernel: tpu_custom_call.1
= control target key start
LH: loop header
LB: loop body
LE: loop exit
PB: predicated region body
PF: predicated region fallthrough
CT: control target
= control target key end

     0   :  { %13 = vsyncpa [#allocation3], 0  ;;  %s2311_s0 = inlined_call_operand.vmem [shape: f32[12,8,4], index: 0, kind: input, shape index: {}]   ;;  %s2312_s1 = inlined_call_operand.vmem [shape: f32[12,8,8], index: 1, kind: input, shape index: {}]   ;;  %s2313_s2 = inlined_call_operand.vmem [shape: f32[12,8,4], index: 2, kind: input, shape index: {}]   ;;  %s2314_s3 = inlined_call_operand.vmem [shape: bf16[4,32], index: 3, kind: input, shape index: {}]   ;;  %s2315_s4 = inlined_call_operand.vmem [shape: f32[1,16], index: 4, kind: input, shape index: {}]   ;;  %s2316_s5 = inlined_call_operand.vmem [shape: bf16[8,8], index: 5, kind: input, shape index: {}]   ;;  %s2317_s6 = inlined_call_operand.vmem [shape: bf16[4,8], index: 6, kind: input, shape index: {}]   ;;  %s2318_s7 = inlined_call_operand.vmem [shape: f32[1,4], index: 7, kind: input, shape index: {}]   ;;  %s2319_s8 = inlined_call_operand.hbm [shape: f32[12,8,20], index: 8, kind: output, shape index: {}]  }
   0x1   :  { %15 = vsyncpa [#allocation3 + $0x1], 0  ;;  %s1722_s27 = smov 0   ;;  %s1724_s28 = smov 0  }
   0x2   :  { %s1726_s29 = smov 0   ;;  %s1728_s30 = smov 0  }
   0x3 LB: > { %s1743_s9 = sadd.s32 4294967295, %s1665_s30   ;;  %s1360_s10 = sadd.s32 4294967294, %s1665_s30   ;;  %s1665_s30 = sphi %s1728_s30, %s2325_s30   ;;  %s1661_s29 = sphi %s1726_s29, %s2324_s29   ;;  %s1657_s28 = sphi %s1724_s28, %s2323_s28   ;;  %s1653_s27 = sphi %s1722_s27, %s2322_s27  }
   0x4   : > { %s1747_s11 = sadd.s32 1, %s1665_s30   ;;  %s211_s12 = sadd.s32 1, %s1661_s29 }
   0x5   : > { %s208_s13 = ssub.s32 %s1665_s30, %s1747_s11  ;;  %p221_p0 = scmp.ne.s32.totalorder %s1661_s29, %s1657_s28 }
   0x6   : > { %p209_p1 = scmp.eq.s32.totalorder %s208_s13, 0  ;;  %p222_p2 = scmp.eq.s32.totalorder %s1743_s9, 1 }
   0x7   : > { %p227_p3 = scmp.ne.s32.totalorder %s1657_s28, %s1653_s27  ;;  %p228_p4 = scmp.eq.s32.totalorder %s1360_s10, 1 }
   0x8   : > { %s1758_s14 = scalar_select %p209_p1, %s1661_s29, %s211_s12  }
   0x9   : > { %p1760_p5 = por %p222_p2, %p221_p0  ;;  %p1764_p6 = por %p228_p4, %p227_p3 }
   0xa   : > { %p1363_p7 = scmp.ge.s32.totalorder %s1665_s30, 1  ;;  %p288_p8 = scmp.lt.s32.totalorder %s1665_s30, 3 }
   0xc   : > { %p289_p9 = pnand %p1363_p7, %p288_p8 }
   0xd   : > { %v361_v0 = vld [vmem:[%s2314_s3] sm:$0x3] (!%p289_p9)  ;;  %vm372_vm0 = vcmask (!%p289_p9), 1041408   ;;  %s332_s19 = smul.u32 (!%p289_p9), 6, %s1743_s9  ;;  %v1667_v1 = vmov (!%p289_p9), 0.0   ;;  %vm1668_vm1 = vmmov (!%p289_p9), 0  }
   0xe   : > { %292 = sbr.rel (%p289_p9) target bundleno = 1404 (0x57c), region = 52  ;;  %1394 = vmatprep.subr.bf16.mxu0 (!%p289_p9), %v1667_v1  ;;  %v374_v2 = vsel (!%p289_p9), %vm372_vm0, %v361_v0, 0  ;;  %1396 = vmatprep.mubr.msk.bf16.mxu0 (!%p289_p9), %vm1668_vm1, %v1667_v1  ;;  %vm362_vm2 = vcmask (!%p289_p9), 31744   ;;  %vm433_vm3 = vcmask (!%p289_p9), 261248   ;;  %s1669_s24 = smov (!%p289_p9), 112   ;;  %vm676_vm4 = vcmask (!%p289_p9), 64544  }
   0xf   : > { %1395 = vmatpush3.bf16.msra.mxu0 (!%p289_p9), %v374_v2  ;;  %p333_p10 = scmp.lt.s32.totalorder (!%p289_p9), %s332_s19, 11  ;;  %1436 = vmatprep.subr.bf16.mxu1 (!%p289_p9), %v1667_v1  ;;  %s1670_s17 = smov (!%p289_p9), 124   ;;  %vm1040_vm5 = vcmask (!%p289_p9), 1043456   ;;  %vm1030_vm6 = vcmask (!%p289_p9), 64512   ;;  %vm1246_vm7 = vcmask (!%p289_p9), 97280   ;;  %vm1253_vm8 = vcmask (!%p289_p9), 162816  }
  0x10   : > { %1418 = vmatprep.mubr.msk.bf16.mxu1 (!%p289_p9), %vm1668_vm1, %v1667_v1  ;;  %1408 = vmatprep.subr.bf16.mxu0 (!%p289_p9), %v1667_v1  ;;  %s1671_s18 = smov (!%p289_p9), 120   ;;  %s1381_s22 = smul.u32 (!%p289_p9), 768, %s1743_s9 }
  0x11   : > { %s1674_s26 = smov (!%p289_p9), [#allocation2]  }
  0x15   : > { %s2327_s19 = smov (!%p333_p10, %s332_s19), 11 }
  0x16   : > { %s1782_s20 = sshll.u32 %s2327_s19, 3  ;;  %s1672_s19 = smov 116  }
  0x17   : > { %s336_s23 = scalar_lea.vmem %s2311_s0, %s1782_s20  ;;  %s1831_s10 = scalar_lea.vmem %s2312_s1, %s1782_s20 }
  0x18   : > { %v352_v3 = vld [vmem:[%s336_s23] sm:$0xff]  ;;  %v353_v4 = vld [vmem:[%s336_s23 + $0x8] sm:$0xff]  ;;  %v354_v6 = vld [vmem:[%s336_s23 + $0x10] sm:$0xff]  ;;  %s2010_s25 = scalar_lea.vmem %s2313_s2, %s1782_s20 }
  0x19   : > { %v358_v5 = vpack.c.bf16 %v353_v4, %v352_v3  ;;  %v355_v7 = vld [vmem:[%s336_s23 + $0x18] sm:$0xff]  ;;  %v356_v9 = vld [vmem:[%s336_s23 + $0x20] sm:$0xff]  ;;  %v357_v10 = vld [vmem:[%s336_s23 + $0x28] sm:$0xff] }
  0x1a   : > { %v359_v8 = vpack.c.bf16 %v355_v7, %v354_v6  ;;  %v360_v11 = vpack.c.bf16 %v357_v10, %v356_v9  ;;  %v1370_v9 = vld [vmem:[%s2315_s4] ss:$0 sm:$0xff] }
  0x1b   : > { %1397 = vmatmul.mubr.msk.bf16.vlgmr.msra.gmra.mrb[0].mxu0 %vm362_vm2, %v358_v5 }
  0x1c   : > { %1400 = vmatprep.mubr.msk.bf16.mxu0 %vm1668_vm1, %v1667_v1 }
  0x23   : > { %1401 = vmatmul.mubr.msk.bf16.gmra.mrb[4].mxu0 %vm362_vm2, %v359_v8 }
  0x24   : > { %1404 = vmatprep.mubr.msk.bf16.mxu0 %vm1668_vm1, %v1667_v1 }
  0x2b   : > { %1405 = vmatmul.mubr.msk.bf16.gmra.mrb[8].mxu0 %vm362_vm2, %v360_v11 }
  0x2c   : > { %1410 = vmatprep.mubr.msk.bf16.mxu0 %vm1668_vm1, %v1667_v1 }
  0xee   : > { %v1797_v12 = vpop.f32.mrb[0].mxu0 }
  0xef   : > { %v434_v13 = vsel %vm433_vm3, %v1797_v12, 0.0  ;;  %v1398_v14 = vpop.f32.mrb[1].mxu0 }
  0xf0   : > { %v435_v15 = vrot.slane %v434_v13, 4  ;;  %v1801_v16 = vpop.f32.mrb[2].mxu0 }
  0xf1   : > { %v441_v17 = vsel %vm433_vm3, %v1801_v16, 0.0  ;;  %v1399_v18 = vpop.f32.mrb[3].mxu0 }
  0xf2   : > { %v436_v19 = vadd.f32 %v435_v15, %v434_v13  ;;  %v442_v20 = vrot.slane %v441_v17, 4  ;;  %v526_v13 = vld [vmem:[%s1831_s10] sm:$0xff] }
  0xf4   : > { %v437_v21 = vrot.slane %v436_v19, 2  ;;  %v443_v22 = vadd.f32 %v442_v20, %v441_v17 }
  0xf6   : > { %v444_v23 = vrot.slane %v443_v22, 2  ;;  %v1805_v24 = vpop.f32.mrb[4].mxu0  ;;  %v438_v25 = vadd.f32 %v437_v21, %v436_v19  ;;  %v527_v19 = vld [vmem:[%s1831_s10 + $0x8] sm:$0xff] }
  0xf7   : > { %v448_v26 = vsel %vm433_vm3, %v1805_v24, 0.0  ;;  %v1402_v27 = vpop.f32.mrb[5].mxu0 }
  0xf8   : > { %v445_v28 = vadd.f32 %v444_v23, %v443_v22  ;;  %v449_v29 = vrot.slane %v448_v26, 4  ;;  %v1809_v30 = vpop.f32.mrb[6].mxu0  ;;  %v439_v31 = vrot.slane %v438_v25, 1 }
  0xf9   : > { %v455_v32 = vsel %vm433_vm3, %v1809_v30, 0.0  ;;  %v1403_v33 = vpop.f32.mrb[7].mxu0 }
  0xfa   : > { %v450_v34 = vadd.f32 %v449_v29, %v448_v26  ;;  %v456_v35 = vrot.slane %v455_v32, 4  ;;  %v440_v36 = vadd.f32 %v439_v31, %v438_v25  ;;  %v446_v37 = vrot.slane %v445_v28, 1 }
  0xfc   : > { %v451_v38 = vrot.slane %v450_v34, 2  ;;  %v457_v39 = vadd.f32 %v456_v35, %v455_v32  ;;  %v477_v40 = vmul.f32 0.125, %v440_v36  ;;  %v447_v41 = vadd.f32 %v446_v37, %v445_v28 }
  0xfe   : > { %v458_v42 = vrot.slane %v457_v39, 2  ;;  %489 = vrot.lane.b32.xlu0 %v477_v40, %s1669_s24  ;;  %v1814_v43 = vpop.f32.mrb[8].mxu0  ;;  %v452_v44 = vadd.f32 %v451_v38, %v450_v34  ;;  %v478_v50 = vmul.f32 0.125, %v447_v41  ;;  %v529_v34 = vld [vmem:[%s1831_s10 + $0x18] sm:$0xff] }
  0xff   : > { %v462_v45 = vsel %vm433_vm3, %v1814_v43, 0.0  ;;  %v1406_v46 = vpop.f32.mrb[9].mxu0 }
 0x100   : > { %v459_v47 = vadd.f32 %v458_v42, %v457_v39  ;;  %v463_v48 = vrot.slane %v462_v45, 4  ;;  %v1818_v49 = vpop.f32.mrb[10].mxu0  ;;  %v453_v51 = vrot.slane %v452_v44, 1  ;;  %v530_v42 = vld [vmem:[%s1831_s10 + $0x20] sm:$0xff] }
 0x101   : > { %v469_v52 = vsel %vm433_vm3, %v1818_v49, 0.0  ;;  %v1407_v53 = vpop.f32.mrb[11].mxu0 }
 0x102   : > { %v464_v54 = vadd.f32 %v463_v48, %v462_v45  ;;  %v470_v55 = vrot.slane %v469_v52, 4  ;;  %491 = vrot.lane.b32.xlu0 %v478_v50, %s1669_s24  ;;  %v454_v56 = vadd.f32 %v453_v51, %v452_v44  ;;  %v460_v57 = vrot.slane %v459_v47, 1 }
 0x104   : > { %v465_v58 = vrot.slane %v464_v54, 2  ;;  %v471_v59 = vadd.f32 %v470_v55, %v469_v52  ;;  %v479_v60 = vmul.f32 0.125, %v454_v56  ;;  %v461_v61 = vadd.f32 %v460_v57, %v459_v47  ;;  %v531_v47 = vld [vmem:[%s1831_s10 + $0x28] sm:$0xff] }
 0x106   : > { %v466_v62 = vadd.f32 %v465_v58, %v464_v54  ;;  %v472_v63 = vrot.slane %v471_v59, 2  ;;  %493 = vrot.lane.b32.xlu1 %v479_v60, %s1669_s24  ;;  %v480_v0 = vmul.f32 0.125, %v461_v61 }
 0x108   : > { %v473_v2 = vadd.f32 %v472_v63, %v471_v59  ;;  %v467_v3 = vrot.slane %v466_v62, 1 }
 0x10a   : > { %495 = vrot.lane.b32.xlu1 %v480_v0, %s1669_s24  ;;  %v468_v4 = vadd.f32 %v467_v3, %v466_v62  ;;  %v474_v5 = vrot.slane %v473_v2, 1 }
 0x10c   : > { %v481_v6 = vmul.f32 0.125, %v468_v4  ;;  %v475_v7 = vadd.f32 %v474_v5, %v473_v2 }
 0x10e   : > { %497 = vrot.lane.b32.xlu0 %v481_v6, %s1669_s24  ;;  %v482_v8 = vmul.f32 0.125, %v475_v7 }
 0x110   : > { %499 = vrot.lane.b32.xlu1 %v482_v8, %s1669_s24  ;;  %s2263_s24 = scalar_lea.hbm %s2319_s8, %s1381_s22 }
 0x170   : > { %v490_v10 = vpop.permute.xlu0 %489 }
 0x171   : > { %v507_v11 = vadd.f32 %v490_v10, %v1797_v12 }
 0x173   : > { %v1838_v14 = vadd.f32 %v1370_v9, %v507_v11 }
 0x174   : > { %v492_v15 = vpop.permute.xlu0 %491 }
 0x175   : > { %v508_v17 = vadd.f32 %v492_v15, %v1801_v16  ;;  %v532_v18 = vadd.f32 %v526_v13, %v1838_v14  ;;  %v528_v16 = vld [vmem:[%s1831_s10 + $0x10] sm:$0xff]  ;;  %s1673_s10 = smov 12  }
 0x177   : > { %v1843_v20 = vadd.f32 %v1370_v9, %v508_v17  ;;  %v538_v21 = vmul.f32 2.0, %v532_v18 }
 0x178   : > { %v494_v22 = vpop.permute.xlu1 %493 }
 0x179   : > { %v509_v23 = vadd.f32 %v494_v22, %v1805_v24  ;;  %v677_v12 = vsel %vm676_vm4, %v538_v21, -inf  ;;  %v544_v25 = vsel %vm362_vm2, %v538_v21, -inf  ;;  %v533_v26 = vadd.f32 %v527_v19, %v1843_v20 }
 0x17a   : > { %678 = vmax.xlane.f32.xlu0 %v677_v12  ;;  %545 = vmax.xlane.f32.xlu1 %v544_v25 }
 0x17b   : > { %v1850_v27 = vadd.f32 %v1370_v9, %v509_v23  ;;  %v539_v28 = vmul.f32 2.0, %v533_v26 }
 0x17c   : > { %v496_v29 = vpop.permute.xlu1 %495 }
 0x17d   : > { %v510_v31 = vadd.f32 %v496_v29, %v1809_v30  ;;  %v547_v32 = vsel %vm362_vm2, %v539_v28, -inf  ;;  %v680_v24 = vsel %vm676_vm4, %v539_v28, -inf  ;;  %v534_v33 = vadd.f32 %v528_v16, %v1850_v27 }
 0x17e   : > { %548 = vmax.xlane.f32.xlu0 %v547_v32  ;;  %681 = vmax.xlane.f32.xlu1 %v680_v24 }
 0x17f   : > { %v1857_v35 = vadd.f32 %v1370_v9, %v510_v31  ;;  %v1859_v36 = vmul.f32 2.0, %v534_v33  ;;  %v869_v33 = vmul.f32 0.5, %v1838_v14 }
 0x180   : > { %v498_v37 = vpop.permute.xlu0 %497 }
 0x181   : > { %v511_v38 = vadd.f32 %v498_v37, %v1814_v43  ;;  %v683_v30 = vsel %vm676_vm4, %v1859_v36, -inf  ;;  %v550_v39 = vsel %vm362_vm2, %v1859_v36, -inf  ;;  %v535_v40 = vadd.f32 %v529_v34, %v1857_v35 }
 0x182   : > { %684 = vmax.xlane.f32.xlu0 %v683_v30  ;;  %551 = vmax.xlane.f32.xlu1 %v550_v39  ;;  %v500_v41 = vpop.permute.xlu1 %499  ;;  %v875_v37 = vmul.f32 1.442695, %v869_v33 }
 0x183   : > { %v1868_v44 = vadd.f32 %v1370_v9, %v511_v38  ;;  %v512_v45 = vadd.f32 %v500_v41, %v1818_v49  ;;  %v1871_v46 = vmul.f32 2.0, %v535_v40 }
 0x185   : > { %v1874_v43 = vadd.f32 %v1370_v9, %v512_v45  ;;  %v686_v48 = vsel %vm676_vm4, %v1871_v46, -inf  ;;  %v536_v50 = vadd.f32 %v530_v42, %v1868_v44  ;;  %v553_v53 = vsel %vm362_vm2, %v1871_v46, -inf }
 0x186   : > { %687 = vmax.xlane.f32.xlu0 %v686_v48 }
 0x187   : > { %v1879_v51 = vmul.f32 2.0, %v536_v50  ;;  %v537_v52 = vadd.f32 %v531_v47, %v1874_v43  ;;  %v874_v32 = vmul.f32 0.5, %v1874_v43 }
 0x189   : > { %v689_v49 = vsel %vm676_vm4, %v1879_v51, -inf  ;;  %v1886_v54 = vmul.f32 2.0, %v537_v52  ;;  %v556_v55 = vsel %vm362_vm2, %v1879_v51, -inf  ;;  %v885_v24 = vmul.f32 1.442695, %v874_v32 }
 0x18a   : > { %554 = vmax.xlane.f32.xlu0 %v553_v53  ;;  %690 = vmax.xlane.f32.xlu1 %v689_v49 }
 0x18b   : > { %v692_v56 = vsel %vm676_vm4, %v1886_v54, -inf  ;;  %v559_v57 = vsel %vm362_vm2, %v1886_v54, -inf }
 0x18e   : > { %557 = vmax.xlane.f32.xlu1 %v556_v55  ;;  %693 = vmax.xlane.f32.xlu0 %v692_v56 }
 0x192   : > { %560 = vmax.xlane.f32.xlu0 %v559_v57 }
 0x207   : > { %v679_v58 = vpop.xlane.xlu0 %678  ;;  %v546_v59 = vpop.xlane.xlu1 %545 }
 0x208   : > { %v695_v60 = vsub.f32 %v538_v21, %v679_v58  ;;  %v562_v61 = vsub.f32 %v538_v21, %v546_v59 }
 0x20a   : > { %v701_v62 = vmul.f32 1.442695, %v695_v60  ;;  %v568_v63 = vmul.f32 1.442695, %v562_v61 }
 0x20b   : > { %v682_v4 = vpop.xlane.xlu1 %681  ;;  %v549_v7 = vpop.xlane.xlu0 %548 }
 0x20c   : > { %1495 = vpow2.f32 %v701_v62  ;;  %v696_v5 = vsub.f32 %v539_v28, %v682_v4  ;;  %v563_v8 = vsub.f32 %v539_v28, %v549_v7 }
 0x20d   : > { %1497 = vpow2.f32 %v568_v63 }
 0x20e   : > { %v703_v6 = vmul.f32 1.442695, %v696_v5  ;;  %v570_v9 = vmul.f32 1.442695, %v563_v8 }
 0x20f   : > { %v685_v10 = vpop.xlane.xlu0 %684  ;;  %v552_v25 = vpop.xlane.xlu1 %551 }
 0x210   : > { %1499 = vpow2.f32 %v703_v6  ;;  %v697_v19 = vsub.f32 %v1859_v36, %v685_v10  ;;  %v564_v34 = vsub.f32 %v1859_v36, %v552_v25 }
 0x211   : > { %1501 = vpow2.f32 %v570_v9  ;;  %v870_v9 = vmul.f32 0.5, %v1843_v20 }
 0x212   : > { %v705_v23 = vmul.f32 1.442695, %v697_v19  ;;  %v572_v38 = vmul.f32 1.442695, %v564_v34 }
 0x213   : > { %v688_v13 = vpop.xlane.xlu0 %687  ;;  %v877_v10 = vmul.f32 1.442695, %v870_v9  ;;  %v956_v9 = vld [vmem:[%s2316_s5] sm:$0xf] }
 0x214   : > { %v698_v36 = vsub.f32 %v1871_v46, %v688_v13 }
 0x216   : > { %v1894_v0 = vpop.eup %1495  ;;  %v707_v47 = vmul.f32 1.442695, %v698_v36 }
 0x217   : > { %v1896_v2 = vpop.eup %1497  ;;  %719 = vrot.lane.b32.xlu1 %v1894_v0, %s1670_s17  ;;  %v555_v15 = vpop.xlane.xlu0 %554 }
 0x218   : > { %v580_v3 = vsel %vm362_vm2, %v1896_v2, 0.0  ;;  %v565_v18 = vsub.f32 %v1871_v46, %v555_v15  ;;  %v691_v28 = vpop.xlane.xlu1 %690  ;;  %v872_v15 = vmul.f32 0.5, %v1857_v35 }
 0x219   : > { %581 = vadd.xlane.f32.xlu0 %v580_v3  ;;  %v699_v29 = vsub.f32 %v1879_v51, %v691_v28  ;;  %v873_v3 = vmul.f32 0.5, %v1868_v44 }
 0x21a   : > { %v1902_v11 = vpop.eup %1499  ;;  %v574_v22 = vmul.f32 1.442695, %v565_v18  ;;  %v881_v18 = vmul.f32 1.442695, %v872_v15 }
 0x21b   : > { %v1906_v17 = vpop.eup %1501  ;;  %v709_v31 = vmul.f32 1.442695, %v699_v29  ;;  %v694_v42 = vpop.xlane.xlu0 %693  ;;  %v883_v7 = vmul.f32 1.442695, %v873_v3  ;;  %v773_v3 = vsel %vm676_vm4, %v1850_v27, -inf }
 0x21c   : > { %v583_v21 = vsel %vm362_vm2, %v1906_v17, 0.0  ;;  %1503 = vpow2.f32 %v574_v22  ;;  %v700_v48 = vsub.f32 %v1886_v54, %v694_v42  ;;  %v558_v57 = vpop.xlane.xlu1 %557 }
 0x21d   : > { %1505 = vpow2.f32 %v705_v23  ;;  %v566_v60 = vsub.f32 %v1879_v51, %v558_v57  ;;  %v871_v51 = vmul.f32 0.5, %v1850_v27 }
 0x21e   : > { %1507 = vpow2.f32 %v709_v31  ;;  %v711_v50 = vmul.f32 1.442695, %v700_v48  ;;  %v779_v48 = vsel %vm676_vm4, %v1868_v44, -inf }
 0x21f   : > { %1509 = vpow2.f32 %v885_v24  ;;  %v561_v52 = vpop.xlane.xlu0 %560  ;;  %v576_v61 = vmul.f32 1.442695, %v566_v60  ;;  %v879_v8 = vmul.f32 1.442695, %v871_v51  ;;  %v892_v60 = vld [vmem:[%s2010_s25 + $0x28] sm:$0xff] }
 0x220   : > { %1511 = vpow2.f32 %v875_v37  ;;  %v567_v53 = vsub.f32 %v1886_v54, %v561_v52 }
 0x221   : > { %1513 = vpow2.f32 %v572_v38 }
 0x222   : > { %1515 = vpow2.f32 %v707_v47  ;;  %v578_v49 = vmul.f32 1.442695, %v567_v53 }
 0x223   : > { %1517 = vpow2.f32 %v711_v50  ;;  %v610_v50 = vsel %vm362_vm2, %v1838_v14, -inf }
 0x224   : > { %1519 = vpow2.f32 %v578_v49  ;;  %v616_v49 = vsel %vm362_vm2, %v1850_v27, -inf }
 0x225   : > { %1521 = vpow2.f32 %v576_v61  ;;  %v891_v61 = vld [vmem:[%s2010_s25 + $0x20] sm:$0xff] }
 0x226   : > { %v1912_v12 = vpop.eup %1503  ;;  %1523 = vpow2.f32 %v883_v7 }
 0x227   : > { %v1914_v26 = vpop.eup %1505  ;;  %v589_v16 = vsel %vm362_vm2, %v1912_v12, 0.0  ;;  %1525 = vpow2.f32 %v879_v8 }
 0x228   : > { %v1924_v30 = vpop.eup %1507  ;;  %1527 = vpow2.f32 %v877_v10 }
 0x229   : > { %v1510_v39 = vpop.eup %1509  ;;  %1529 = vpow2.f32 %v881_v18  ;;  %v776_v18 = vsel %vm676_vm4, %v1857_v35, -inf }
 0x22a   : > { %v1512_v40 = vpop.eup %1511 }
 0x22b   : > { %v1929_v41 = vpop.eup %1513 }
 0x22c   : > { %v586_v45 = vsel %vm362_vm2, %v1929_v41, 0.0  ;;  %v1939_v46 = vpop.eup %1515 }
 0x22d   : > { %v1943_v55 = vpop.eup %1517 }
 0x22e   : > { %v1947_v56 = vpop.eup %1519 }
 0x22f   : > { %721 = vrot.lane.b32.xlu0 %v1902_v11, %s1670_s17  ;;  %v595_v58 = vsel %vm362_vm2, %v1947_v56, 0.0  ;;  %v1953_v62 = vpop.eup %1521 }
 0x230   : > { %v592_v4 = vsel %vm362_vm2, %v1953_v62, 0.0  ;;  %v1524_v13 = vpop.eup %1523 }
 0x231   : > { %v1526_v19 = vpop.eup %1525 }
 0x232   : > { %v1528_v23 = vpop.eup %1527 }
 0x233   : > { %v1530_v25 = vpop.eup %1529 }
 0x23b   : > { %584 = vadd.xlane.f32.xlu1 %v583_v21  ;;  %v960_v21 = vld [vmem:[%s2317_s6] sm:$0x3] }
 0x23c   : > { %v971_v22 = vsel %vm372_vm0, %v960_v21, 0 }
 0x23d   : > { %1437 = vmatpush3.bf16.msra.mxu1 %v971_v22  ;;  %1409 = vmatpush3.bf16.msra.mxu0 %v971_v22 }
 0x23e   : > { %1422 = vmatprep.subr.bf16.mxu1 %v1667_v1 }
 0x24c   : > { %723 = vrot.lane.b32.xlu1 %v1914_v26, %s1670_s17 }
 0x24e   : > { %590 = vadd.xlane.f32.xlu0 %v589_v16 }
 0x264   : > { %727 = vrot.lane.b32.xlu0 %v1924_v30, %s1670_s17 }
 0x268   : > { %909 = vrot.lane.b32.xlu0 %v1510_v39, %s1671_s18 }
 0x26c   : > { %899 = vrot.lane.b32.xlu0 %v1512_v40, %s1671_s18 }
 0x270   : > { %929 = vrot.lane.b32.xlu0 %v1838_v14, %s1672_s19  ;;  %587 = vadd.xlane.f32.xlu1 %v586_v45  ;;  %v770_v45 = vsel %vm676_vm4, %v1843_v20, -inf }
 0x281   : > { %725 = vrot.lane.b32.xlu1 %v1939_v46, %s1670_s17 }
 0x285   : > { %729 = vrot.lane.b32.xlu1 %v1943_v55, %s1670_s17 }
 0x289   : > { %v720_v54 = vpop.permute.xlu1 %719 }
 0x28a   : > { %v737_v59 = vsel %vm362_vm2, %v720_v54, 0.0  ;;  %v622_v54 = vsel %vm362_vm2, %v1868_v44, -inf }
 0x28f   : > { %596 = vadd.xlane.f32.xlu0 %v595_v58 }
 0x293   : > { %738 = vadd.xlane.f32.xlu0 %v737_v59  ;;  %v767_v59 = vsel %vm676_vm4, %v1838_v14, -inf }
 0x2a6   : > { %v1955_v63 = vpop.xlane.xlu0 %581 }
 0x2a9   : > { %593 = vadd.xlane.f32.xlu1 %v592_v4 }
 0x2aa   : > { %v722_v5 = vpop.permute.xlu0 %721 }
 0x2ab   : > { %v740_v6 = vsel %vm362_vm2, %v722_v5, 0.0 }
 0x2ac   : > { %741 = vadd.xlane.f32.xlu0 %v740_v6 }
 0x2ba   : > { %907 = vrot.lane.b32.xlu1 %v1524_v13, %s1671_s18 }
 0x2be   : > { %937 = vrot.lane.b32.xlu1 %v1868_v44, %s1672_s19 }
 0x2c2   : > { %903 = vrot.lane.b32.xlu0 %v1526_v19, %s1671_s18  ;;  %939 = vrot.lane.b32.xlu1 %v1874_v43, %s1672_s19 }
 0x2c6   : > { %901 = vrot.lane.b32.xlu1 %v1528_v23, %s1671_s18 }
 0x2c8   : > { %v585_v16 = vpop.xlane.xlu1 %584 }
 0x2ca   : > { %931 = vrot.lane.b32.xlu1 %v1843_v20, %s1672_s19 }
 0x2cc   : > { %v724_v29 = vpop.permute.xlu1 %723 }
 0x2cd   : > { %v743_v31 = vsel %vm362_vm2, %v724_v29, 0.0  ;;  %v887_v29 = vld [vmem:[%s2010_s25] sm:$0xff] }
 0x2ce   : > { %905 = vrot.lane.b32.xlu1 %v1530_v25, %s1671_s18 }
 0x2db   : > { %v1979_v28 = vpop.xlane.xlu0 %590 }
 0x2df   : > { %v728_v32 = vpop.permute.xlu0 %727 }
 0x2e0   : > { %v749_v24 = vsel %vm362_vm2, %v728_v32, 0.0 }
 0x2e3   : > { %v910_v40 = vpop.permute.xlu0 %909 }
 0x2e4   : > { %v922_v6 = vmul.f32 %v910_v40, %v892_v60  ;;  %v613_v40 = vsel %vm362_vm2, %v1843_v20, -inf }
 0x2e7   : > { %v900_v36 = vpop.permute.xlu0 %899 }
 0x2eb   : > { %v930_v42 = vpop.permute.xlu0 %929 }
 0x2f2   : > { %744 = vadd.xlane.f32.xlu1 %v743_v31  ;;  %v888_v31 = vld [vmem:[%s2010_s25 + $0x8] sm:$0xff] }
 0x2f6   : > { %750 = vadd.xlane.f32.xlu1 %v749_v24 }
 0x2fd   : > { %v1983_v33 = vpop.xlane.xlu1 %587 }
 0x301   : > { %v726_v34 = vpop.permute.xlu1 %725 }
 0x302   : > { %v746_v37 = vsel %vm362_vm2, %v726_v34, 0.0 }
 0x303   : > { %747 = vadd.xlane.f32.xlu0 %v746_v37 }
 0x305   : > { %v730_v38 = vpop.permute.xlu1 %729 }
 0x306   : > { %v752_v39 = vsel %vm362_vm2, %v730_v38, 0.0 }
 0x307   : > { %935 = vrot.lane.b32.xlu1 %v1857_v35, %s1672_s19  ;;  %753 = vadd.xlane.f32.xlu0 %v752_v39 }
 0x31c   : > { %v1993_v47 = vpop.xlane.xlu0 %596 }
 0x31d   : > { %933 = vrot.lane.b32.xlu0 %v1850_v27, %s1672_s19 }
 0x320   : > { %v739_v52 = vpop.xlane.xlu0 %738 }
 0x321   : > { %1531 = vrcp.f32 %v739_v52 }
 0x322   : > { %1533 = vrcp.f32 %v1955_v63 }
 0x323   : > { %1535 = vrcp.f32 %v585_v16  ;;  %v1042_v16 = vsel %vm1040_vm5, %v956_v9, 0 }
 0x32b   : > { %771 = vmax.xlane.f32.xlu1 %v770_v45  ;;  %v1532_v4 = vpop.eup %1531 }
 0x32c   : > { %v1534_v5 = vpop.eup %1533  ;;  %v761_v10 = vmul.f32 %v1532_v4, %v1894_v0  ;;  %v782_v0 = vsel %vm676_vm4, %v1874_v43, -inf }
 0x32d   : > { %v1536_v51 = vpop.eup %1535  ;;  %v604_v21 = vmul.f32 %v1534_v5, %v1896_v2 }
 0x32e   : > { %v605_v22 = vmul.f32 %v1536_v51, %v1906_v17  ;;  %v917_v17 = vmul.f32 %v900_v36, %v887_v29  ;;  %v619_v36 = vsel %vm362_vm2, %v1857_v35, -inf }
 0x32f   : > { %780 = vmax.xlane.f32.xlu1 %v779_v48  ;;  %v857_v24 = vsel %vm362_vm2, %v604_v21, %v761_v10 }
 0x330   : > { %v947_v38 = vadd.f32 %v930_v42, %v917_v17  ;;  %v625_v42 = vsel %vm362_vm2, %v1874_v43, -inf }
 0x333   : > { %611 = vmax.xlane.f32.xlu1 %v610_v50 }
 0x336   : > { %v1999_v53 = vpop.xlane.xlu1 %593 }
 0x337   : > { %617 = vmax.xlane.f32.xlu1 %v616_v49 }
 0x339   : > { %v742_v57 = vpop.xlane.xlu0 %741 }
 0x33a   : > { %1537 = vrcp.f32 %v742_v57  ;;  %v908_v58 = vpop.permute.xlu1 %907 }
 0x33b   : > { %623 = vmax.xlane.f32.xlu1 %v622_v54  ;;  %v921_v7 = vmul.f32 %v908_v58, %v891_v61  ;;  %v889_v58 = vld [vmem:[%s2010_s25 + $0x10] sm:$0xff]  ;;  %v890_v54 = vld [vmem:[%s2010_s25 + $0x18] sm:$0xff] }
 0x33c   : > { %768 = vmax.xlane.f32.xlu0 %v767_v59 }
 0x33d   : > { %v904_v52 = vpop.permute.xlu0 %903 }
 0x33e   : > { %v938_v63 = vpop.permute.xlu1 %937 }
 0x33f   : > { %v951_v13 = vadd.f32 %v938_v63, %v921_v7  ;;  %v919_v63 = vmul.f32 %v904_v52, %v889_v58 }
 0x340   : > { %774 = vmax.xlane.f32.xlu0 %v773_v3 }
 0x342   : > { %v940_v8 = vpop.permute.xlu1 %939 }
 0x343   : > { %v952_v15 = vadd.f32 %v940_v8, %v922_v6 }
 0x344   : > { %v1538_v19 = vpop.eup %1537  ;;  %777 = vmax.xlane.f32.xlu0 %v776_v18 }
 0x345   : > { %v762_v23 = vmul.f32 %v1538_v19, %v1902_v11  ;;  %v959_v25 = vpack.c.bf16 %v952_v15, %v951_v13 }
 0x346   : > { %v902_v32 = vpop.permute.xlu1 %901 }
 0x347   : > { %1419 = vmatmul.mubr.msk.bf16.vlgmr.msra.gmra.mrb[0].mxu1 %vm362_vm2, %v959_v25  ;;  %v858_v34 = vsel %vm362_vm2, %v605_v22, %v762_v23  ;;  %v918_v37 = vmul.f32 %v902_v32, %v888_v31 }
 0x348   : > { %783 = vmax.xlane.f32.xlu0 %v782_v0  ;;  %1423 = vmatpush3.bf16.msra.mxu1 %v1042_v16  ;;  %v953_v2 = vpack.c.bf16 %v858_v34, %v857_v24 }
 0x349   : > { %1424 = vmatprep.mubr.msk.bf16.mxu1 %vm1668_vm1, %v1667_v1 }
 0x34a   : > { %v932_v11 = vpop.permute.xlu1 %931 }
 0x34b   : > { %v948_v39 = vadd.f32 %v932_v11, %v918_v37 }
 0x34c   : > { %614 = vmax.xlane.f32.xlu0 %v613_v40 }
 0x34d   : > { %v957_v45 = vpack.c.bf16 %v948_v39, %v947_v38 }
 0x34e   : > { %v906_v48 = vpop.permute.xlu1 %905 }
 0x34f   : > { %1411 = vmatmul.mubr.msk.bf16.vlgmr.msra.gmra.mrb[12].mxu0 %vm362_vm2, %v957_v45  ;;  %1425 = vmatmul.mubr.msk.bf16.vlgmr.msra.gmra.mrb[4].mxu1 %vm1030_vm6, %v953_v2  ;;  %v920_v3 = vmul.f32 %v906_v48, %v890_v54 }
 0x350   : > { %620 = vmax.xlane.f32.xlu0 %v619_v36  ;;  %1414 = vmatprep.mubr.msk.bf16.mxu0 %vm1668_vm1, %v1667_v1 }
 0x351   : > { %1428 = vmatprep.mubr.msk.bf16.mxu1 %vm1668_vm1, %v1667_v1 }
 0x354   : > { %626 = vmax.xlane.f32.xlu0 %v625_v42 }
 0x37f   : > { %v745_v50 = vpop.xlane.xlu1 %744 }
 0x380   : > { %1539 = vrcp.f32 %v745_v50 }
 0x381   : > { %1541 = vrcp.f32 %v1979_v28 }
 0x382   : > { %1543 = vrcp.f32 %v1983_v33 }
 0x383   : > { %v751_v49 = vpop.xlane.xlu1 %750 }
 0x384   : > { %1545 = vrcp.f32 %v751_v49 }
 0x387   : > { %v936_v60 = vpop.permute.xlu1 %935 }
 0x388   : > { %v950_v6 = vadd.f32 %v936_v60, %v920_v3 }
 0x38a   : > { %v1540_v61 = vpop.eup %1539 }
 0x38b   : > { %v1542_v4 = vpop.eup %1541  ;;  %v763_v51 = vmul.f32 %v1540_v61, %v1914_v26 }
 0x38c   : > { %v1544_v28 = vpop.eup %1543 }
 0x38d   : > { %v606_v10 = vmul.f32 %v1544_v28, %v1929_v41 }
 0x38e   : > { %v1546_v7 = vpop.eup %1545 }
 0x38f   : > { %v765_v18 = vmul.f32 %v1546_v7, %v1924_v30  ;;  %v859_v19 = vsel %vm362_vm2, %v606_v10, %v763_v51 }
 0x390   : > { %v748_v57 = vpop.xlane.xlu0 %747 }
 0x391   : > { %1547 = vrcp.f32 %v748_v57 }
 0x392   : > { %1549 = vrcp.f32 %v1993_v47 }
 0x393   : > { %1551 = vrcp.f32 %v1999_v53  ;;  %v607_v53 = vmul.f32 %v1542_v4, %v1912_v12 }
 0x394   : > { %v754_v59 = vpop.xlane.xlu0 %753 }
 0x395   : > { %1553 = vrcp.f32 %v754_v59 }
 0x398   : > { %v934_v5 = vpop.permute.xlu0 %933 }
 0x399   : > { %v949_v33 = vadd.f32 %v934_v5, %v919_v63 }
 0x39b   : > { %v1548_v8 = vpop.eup %1547  ;;  %v958_v47 = vpack.c.bf16 %v950_v6, %v949_v33 }
 0x39c   : > { %v1550_v9 = vpop.eup %1549  ;;  %v764_v13 = vmul.f32 %v1548_v8, %v1939_v46 }
 0x39d   : > { %v1552_v15 = vpop.eup %1551  ;;  %1415 = vmatmul.mubr.msk.bf16.gmra.mrb[16].mxu0 %vm362_vm2, %v958_v47  ;;  %v609_v23 = vmul.f32 %v1550_v9, %v1947_v56 }
 0x39e   : > { %v860_v21 = vsel %vm362_vm2, %v607_v53, %v764_v13  ;;  %v608_v25 = vmul.f32 %v1552_v15, %v1953_v62 }
 0x39f   : > { %v1554_v22 = vpop.eup %1553  ;;  %v954_v26 = vpack.c.bf16 %v860_v21, %v859_v19 }
 0x3a0   : > { %v766_v12 = vmul.f32 %v1554_v22, %v1943_v55  ;;  %v861_v41 = vsel %vm362_vm2, %v608_v25, %v765_v18 }
 0x3a1   : > { %1429 = vmatmul.mubr.msk.bf16.gmra.mrb[8].mxu1 %vm1030_vm6, %v954_v26 }
 0x3a2   : > { %1432 = vmatprep.mubr.msk.bf16.mxu1 %vm1668_vm1, %v1667_v1  ;;  %v862_v30 = vsel %vm362_vm2, %v609_v23, %v766_v12 }
 0x3a3   : > { %v955_v46 = vpack.c.bf16 %v862_v30, %v861_v41 }
 0x3a9   : > { %1433 = vmatmul.mubr.msk.bf16.gmra.mrb[0].mxu1 %vm1030_vm6, %v955_v46 }
 0x3b8   : > { %v772_v16 = vpop.xlane.xlu1 %771 }
 0x3b9   : > { %v786_v29 = vsub.f32 %v1843_v20, %v772_v16 }
 0x3bb   : > { %v793_v56 = vmul.f32 1.442695, %v786_v29 }
 0x3bc   : > { %v781_v31 = vpop.xlane.xlu1 %780 }
 0x3bd   : > { %1555 = vpow2.f32 %v793_v56  ;;  %v789_v55 = vsub.f32 %v1868_v44, %v781_v31 }
 0x3bf   : > { %v799_v62 = vmul.f32 1.442695, %v789_v55 }
 0x3c0   : > { %v612_v37 = vpop.xlane.xlu1 %611 }
 0x3c1   : > { %1557 = vpow2.f32 %v799_v62  ;;  %v628_v45 = vsub.f32 %v1838_v14, %v612_v37 }
 0x3c3   : > { %v634_v49 = vmul.f32 1.442695, %v628_v45 }
 0x3c4   : > { %v618_v42 = vpop.xlane.xlu1 %617 }
 0x3c5   : > { %v630_v57 = vsub.f32 %v1850_v27, %v618_v42 }
 0x3c7   : > { %v2073_v32 = vpop.eup %1555  ;;  %v638_v59 = vmul.f32 1.442695, %v630_v57 }
 0x3c8   : > { %811 = vrot.lane.b32.xlu0 %v2073_v32, %s1670_s17  ;;  %v624_v13 = vpop.xlane.xlu1 %623 }
 0x3c9   : > { %v769_v1 = vpop.xlane.xlu0 %768  ;;  %v632_v18 = vsub.f32 %v1868_v44, %v624_v13 }
 0x3ca   : > { %v785_v0 = vsub.f32 %v1838_v14, %v769_v1 }
 0x3cb   : > { %v2078_v24 = vpop.eup %1557  ;;  %v642_v21 = vmul.f32 1.442695, %v632_v18 }
 0x3cc   : > { %v791_v34 = vmul.f32 1.442695, %v785_v0  ;;  %817 = vrot.lane.b32.xlu0 %v2078_v24, %s1670_s17 }
 0x3cd   : > { %v775_v2 = vpop.xlane.xlu0 %774 }
 0x3ce   : > { %1559 = vpow2.f32 %v791_v34  ;;  %v787_v17 = vsub.f32 %v1850_v27, %v775_v2 }
 0x3d0   : > { %v795_v11 = vmul.f32 1.442695, %v787_v17 }
 0x3d1   : > { %v778_v38 = vpop.xlane.xlu0 %777 }
 0x3d2   : > { %1561 = vpow2.f32 %v795_v11  ;;  %v788_v39 = vsub.f32 %v1857_v35, %v778_v38 }
 0x3d4   : > { %v797_v40 = vmul.f32 1.442695, %v788_v39 }
 0x3d5   : > { %v784_v36 = vpop.xlane.xlu0 %783 }
 0x3d6   : > { %1563 = vpow2.f32 %v797_v40  ;;  %v790_v48 = vsub.f32 %v1874_v43, %v784_v36 }
 0x3d8   : > { %v2086_v50 = vpop.eup %1559  ;;  %v801_v52 = vmul.f32 1.442695, %v790_v48 }
 0x3d9   : > { %809 = vrot.lane.b32.xlu1 %v2086_v50, %s1670_s17  ;;  %v615_v58 = vpop.xlane.xlu0 %614 }
 0x3da   : > { %1565 = vpow2.f32 %v801_v52  ;;  %v629_v10 = vsub.f32 %v1843_v20, %v615_v58 }
 0x3db   : > { %1567 = vpow2.f32 %v634_v49 }
 0x3dc   : > { %v2091_v54 = vpop.eup %1561  ;;  %1569 = vpow2.f32 %v638_v59  ;;  %v636_v19 = vmul.f32 1.442695, %v629_v10 }
 0x3dd   : > { %813 = vrot.lane.b32.xlu1 %v2091_v54, %s1670_s17  ;;  %v621_v60 = vpop.xlane.xlu0 %620 }
 0x3de   : > { %v631_v61 = vsub.f32 %v1857_v35, %v621_v60 }
 0x3e0   : > { %v2096_v63 = vpop.eup %1563  ;;  %v640_v3 = vmul.f32 1.442695, %v631_v61 }
 0x3e1   : > { %815 = vrot.lane.b32.xlu1 %v2096_v63, %s1670_s17  ;;  %v627_v4 = vpop.xlane.xlu0 %626 }
 0x3e2   : > { %v633_v5 = vsub.f32 %v1874_v43, %v627_v4  ;;  %1571 = vpow2.f32 %v640_v3 }
 0x3e4   : > { %v2101_v28 = vpop.eup %1565  ;;  %v644_v6 = vmul.f32 1.442695, %v633_v5 }
 0x3e5   : > { %819 = vrot.lane.b32.xlu1 %v2101_v28, %s1670_s17  ;;  %v2105_v33 = vpop.eup %1567 }
 0x3e6   : > { %1573 = vpow2.f32 %v644_v6  ;;  %v646_v7 = vsel %vm362_vm2, %v2105_v33, 0.0  ;;  %v2109_v51 = vpop.eup %1569 }
 0x3e7   : > { %v652_v8 = vsel %vm362_vm2, %v2109_v51, 0.0  ;;  %1575 = vpow2.f32 %v636_v19 }
 0x3e8   : > { %1577 = vpow2.f32 %v642_v21 }
 0x3eb   : > { %647 = vadd.xlane.f32.xlu0 %v646_v7 }
 0x3ec   : > { %v2113_v47 = vpop.eup %1571 }
 0x3ed   : > { %v655_v9 = vsel %vm362_vm2, %v2113_v47, 0.0 }
 0x3ef   : > { %653 = vadd.xlane.f32.xlu0 %v652_v8 }
 0x3f0   : > { %v2117_v53 = vpop.eup %1573 }
 0x3f1   : > { %v661_v15 = vsel %vm362_vm2, %v2117_v53, 0.0  ;;  %v2123_v22 = vpop.eup %1575 }
 0x3f2   : > { %v649_v26 = vsel %vm362_vm2, %v2123_v22, 0.0  ;;  %v2127_v23 = vpop.eup %1577 }
 0x3f3   : > { %656 = vadd.xlane.f32.xlu0 %v655_v9  ;;  %v658_v25 = vsel %vm362_vm2, %v2127_v23, 0.0 }
 0x3f7   : > { %662 = vadd.xlane.f32.xlu0 %v661_v15 }
 0x409   : > { %650 = vadd.xlane.f32.xlu1 %v649_v26 }
 0x40d   : > { %659 = vadd.xlane.f32.xlu1 %v658_v25 }
 0x422   : > { %v1007_v12 = vpop.f32.mrb[12].mxu0  ;;  %v1078_v41 = vpop.f32.mrb[4].mxu1 }
 0x423   : > { %v2131_v30 = vadd.f32 %v1078_v41, %v1007_v12  ;;  %v1412_v46 = vpop.f32.mrb[13].mxu0  ;;  %v1426_v16 = vpop.f32.mrb[5].mxu1 }
 0x424   : > { %v1010_v29 = vpop.f32.mrb[14].mxu0  ;;  %v1081_v56 = vpop.f32.mrb[6].mxu1 }
 0x425   : > { %v2133_v31 = vadd.f32 %v1081_v56, %v1010_v29  ;;  %v1413_v55 = vpop.f32.mrb[15].mxu0  ;;  %v1427_v62 = vpop.f32.mrb[7].mxu1  ;;  %v1101_v10 = vsel %vm676_vm4, %v2131_v30, 0.0 }
 0x426   : > { %v1102_v15 = vrot.slane %v1101_v10, 4 }
 0x428   : > { %v1103_v26 = vadd.f32 %v1102_v15, %v1101_v10 }
 0x42a   : > { %v1104_v46 = vrot.slane %v1103_v26, 2 }
 0x42c   : > { %v1105_v55 = vadd.f32 %v1104_v46, %v1103_v26 }
 0x43a   : > { %v812_v1 = vpop.permute.xlu0 %811 }
 0x43b   : > { %v830_v0 = vsel %vm362_vm2, %v812_v1, 0.0 }
 0x43c   : > { %831 = vadd.xlane.f32.xlu0 %v830_v0 }
 0x43e   : > { %v818_v11 = vpop.permute.xlu0 %817 }
 0x43f   : > { %v839_v39 = vsel %vm362_vm2, %v818_v11, 0.0 }
 0x44b   : > { %v810_v34 = vpop.permute.xlu1 %809 }
 0x44c   : > { %v827_v2 = vsel %vm362_vm2, %v810_v34, 0.0  ;;  %v1108_v34 = vsel %vm676_vm4, %v2133_v31, 0.0 }
 0x44d   : > { %828 = vadd.xlane.f32.xlu1 %v827_v2 }
 0x44f   : > { %v814_v17 = vpop.permute.xlu1 %813 }
 0x450   : > { %v833_v37 = vsel %vm362_vm2, %v814_v17, 0.0 }
 0x451   : > { %834 = vadd.xlane.f32.xlu1 %v833_v37 }
 0x453   : > { %v816_v38 = vpop.permute.xlu1 %815 }
 0x454   : > { %v836_v40 = vsel %vm362_vm2, %v816_v38, 0.0  ;;  %v1106_v38 = vrot.slane %v1105_v55, 1 }
 0x455   : > { %840 = vadd.xlane.f32.xlu1 %v839_v39  ;;  %837 = vadd.xlane.f32.xlu0 %v836_v40  ;;  %v1109_v39 = vrot.slane %v1108_v34, 4 }
 0x457   : > { %v820_v45 = vpop.permute.xlu1 %819 }
 0x458   : > { %v842_v36 = vsel %vm362_vm2, %v820_v45, 0.0 }
 0x459   : > { %843 = vadd.xlane.f32.xlu0 %v842_v36 }
 0x466   : > { %1194 = vrot.lane.b32.xlu1 %v1843_v20, %s1671_s18 }
 0x46a   : > { %1198 = vrot.lane.b32.xlu1 %v1857_v35, %s1671_s18 }
 0x46e   : > { %1202 = vrot.lane.b32.xlu1 %v1874_v43, %s1671_s18 }
 0x46f   : > { %1192 = vrot.lane.b32.xlu0 %v1838_v14, %s1671_s18 }
 0x470   : > { %v1015_v42 = vpop.f32.mrb[16].mxu0 }
 0x471   : > { %v1416_v48 = vpop.f32.mrb[17].mxu0 }
 0x472   : > { %v1018_v52 = vpop.f32.mrb[18].mxu0 }
 0x473   : > { %1196 = vrot.lane.b32.xlu0 %v1850_v27, %s1671_s18  ;;  %v1417_v49 = vpop.f32.mrb[19].mxu0 }
 0x474   : > { %v1086_v57 = vpop.f32.mrb[8].mxu1 }
 0x475   : > { %v2151_v58 = vadd.f32 %v1086_v57, %v1015_v42  ;;  %v1430_v59 = vpop.f32.mrb[9].mxu1  ;;  %v1107_v57 = vadd.f32 %v1106_v38, %v1105_v55 }
 0x476   : > { %v1089_v60 = vpop.f32.mrb[10].mxu1 }
 0x477   : > { %v2153_v61 = vadd.f32 %v1089_v60, %v1018_v52  ;;  %v1431_v3 = vpop.f32.mrb[11].mxu1  ;;  %1200 = vrot.lane.b32.xlu0 %v1868_v44, %s1671_s18  ;;  %v1115_v18 = vsel %vm676_vm4, %v2151_v58, 0.0  ;;  %v1110_v60 = vadd.f32 %v1109_v39, %v1108_v34  ;;  %v1143_v15 = vmul.f32 0.125, %v1107_v57 }
 0x478   : > { %v648_v8 = vpop.xlane.xlu0 %647  ;;  %v1116_v25 = vrot.slane %v1115_v18, 4 }
 0x479   : > { %v1122_v12 = vsel %vm676_vm4, %v2153_v61, 0.0 }
 0x47a   : > { %v1117_v16 = vadd.f32 %v1116_v25, %v1115_v18  ;;  %v1123_v29 = vrot.slane %v1122_v12, 4 }
 0x47c   : > { %v2157_v4 = vpop.f32.mrb[0].mxu1  ;;  %v2161_v9 = vpop.xlane.xlu0 %653  ;;  %v1118_v62 = vrot.slane %v1117_v16, 2  ;;  %v1124_v1 = vadd.f32 %v1123_v29, %v1122_v12 }
 0x47d   : > { %v1434_v5 = vpop.f32.mrb[1].mxu1  ;;  %v1129_v45 = vsel %vm676_vm4, %v2157_v4, 0.0 }
 0x47e   : > { %v2159_v6 = vpop.f32.mrb[2].mxu1  ;;  %v1119_v17 = vadd.f32 %v1118_v62, %v1117_v16  ;;  %v1125_v37 = vrot.slane %v1124_v1, 2  ;;  %v1130_v3 = vrot.slane %v1129_v45, 4 }
 0x47f   : > { %v1435_v7 = vpop.f32.mrb[3].mxu1  ;;  %v1136_v56 = vsel %vm676_vm4, %v2159_v6, 0.0 }
 0x480   : > { %v657_v13 = vpop.xlane.xlu0 %656  ;;  %v1137_v0 = vrot.slane %v1136_v56, 4  ;;  %v1126_v48 = vadd.f32 %v1125_v37, %v1124_v1  ;;  %v1120_v59 = vrot.slane %v1119_v17, 1 }
 0x482   : > { %v1138_v11 = vadd.f32 %v1137_v0, %v1136_v56  ;;  %v1121_v18 = vadd.f32 %v1120_v59, %v1119_v17 }
 0x484   : > { %v2167_v19 = vpop.xlane.xlu0 %662  ;;  %v1139_v52 = vrot.slane %v1138_v11, 2  ;;  %v1145_v25 = vmul.f32 0.125, %v1121_v18 }
 0x486   : > { %v1140_v7 = vadd.f32 %v1139_v52, %v1138_v11 }
 0x496   : > { %v651_v21 = vpop.xlane.xlu1 %650 }
 0x497   : > { %1579 = vrcp.f32 %v651_v21  ;;  %v1111_v21 = vrot.slane %v1110_v60, 2 }
 0x499   : > { %v1112_v46 = vadd.f32 %v1111_v21, %v1110_v60 }
 0x49a   : > { %v660_v49 = vpop.xlane.xlu1 %659 }
 0x49b   : > { %v1113_v0 = vrot.slane %v1112_v46, 1 }
 0x49d   : > { %v1114_v11 = vadd.f32 %v1113_v0, %v1112_v46 }
 0x4a1   : > { %v1580_v2 = vpop.eup %1579 }
 0x4a2   : > { %v671_v36 = vmul.f32 %v1580_v2, %v2123_v22  ;;  %v1127_v22 = vrot.slane %v1126_v48, 1 }
 0x4a4   : > { %v1128_v12 = vadd.f32 %v1127_v22, %v1126_v48 }
 0x4a6   : > { %v1146_v29 = vmul.f32 0.125, %v1128_v12 }
 0x4c9   : > { %v832_v41 = vpop.xlane.xlu0 %831 }
 0x4ca   : > { %1581 = vrcp.f32 %v832_v41  ;;  %v1141_v41 = vrot.slane %v1140_v7, 1 }
 0x4cb   : > { %1583 = vrcp.f32 %v648_v8 }
 0x4cc   : > { %v1142_v56 = vadd.f32 %v1141_v41, %v1140_v7 }
 0x4ce   : > { %v1148_v17 = vmul.f32 0.125, %v1142_v56 }
 0x4d4   : > { %v1582_v40 = vpop.eup %1581 }
 0x4d5   : > { %v852_v42 = vmul.f32 %v1582_v40, %v2073_v32  ;;  %v1131_v32 = vadd.f32 %v1130_v3, %v1129_v45  ;;  %v1584_v55 = vpop.eup %1583  ;;  %v1144_v40 = vmul.f32 0.125, %v1114_v11 }
 0x4d7   : > { %v864_v5 = vsel %vm362_vm2, %v671_v36, %v852_v42  ;;  %v1132_v16 = vrot.slane %v1131_v32, 2 }
 0x4d8   : > { %1218 = vrot.lane.b32.xlu1 %v864_v5, %s1673_s10 }
 0x4d9   : > { %v1133_v62 = vadd.f32 %v1132_v16, %v1131_v32 }
 0x4da   : > { %v829_v10 = vpop.xlane.xlu1 %828 }
 0x4db   : > { %1585 = vrcp.f32 %v829_v10  ;;  %v1134_v38 = vrot.slane %v1133_v62, 1 }
 0x4dc   : > { %1155 = vrot.lane.b32.xlu1 %v1143_v15, %s1670_s17  ;;  %1587 = vrcp.f32 %v657_v13  ;;  %v670_v13 = vmul.f32 %v1584_v55, %v2105_v33 }
 0x4de   : > { %v835_v26 = vpop.xlane.xlu1 %834 }
 0x4df   : > { %1589 = vrcp.f32 %v835_v26 }
 0x4e0   : > { %1159 = vrot.lane.b32.xlu1 %v1145_v25, %s1670_s17  ;;  %v1377_v25 = vld [vmem:[%s2318_s7] ss:$0 sm:$0xff] }
 0x4e2   : > { %v838_v8 = vpop.xlane.xlu0 %837  ;;  %v841_v1 = vpop.xlane.xlu1 %840 }
 0x4e3   : > { %1591 = vrcp.f32 %v838_v8 }
 0x4e4   : > { %1593 = vrcp.f32 %v2161_v9  ;;  %1161 = vrot.lane.b32.xlu1 %v1146_v29, %s1670_s17 }
 0x4e5   : > { %v1586_v34 = vpop.eup %1585  ;;  %1595 = vrcp.f32 %v2167_v19  ;;  %v1135_v19 = vadd.f32 %v1134_v38, %v1133_v62 }
 0x4e6   : > { %1597 = vrcp.f32 %v841_v1  ;;  %v844_v2 = vpop.xlane.xlu0 %843  ;;  %v851_v37 = vmul.f32 %v1586_v34, %v2086_v50  ;;  %v1588_v9 = vpop.eup %1587 }
 0x4e7   : > { %1599 = vrcp.f32 %v844_v2  ;;  %v673_v50 = vmul.f32 %v1588_v9, %v2113_v47  ;;  %v1147_v52 = vmul.f32 0.125, %v1135_v19 }
 0x4e8   : > { %1165 = vrot.lane.b32.xlu1 %v1148_v17, %s1670_s17  ;;  %v863_v39 = vsel %vm362_vm2, %v670_v13, %v851_v37  ;;  %1601 = vrcp.f32 %v660_v49 }
 0x4e9   : > { %1216 = vrot.lane.b32.xlu0 %v863_v39, %s1673_s10  ;;  %v1590_v45 = vpop.eup %1589 }
 0x4ea   : > { %v853_v49 = vmul.f32 %v1590_v45, %v2091_v54  ;;  %v1193_v21 = vpop.permute.xlu0 %1192 }
 0x4ed   : > { %v1592_v36 = vpop.eup %1591  ;;  %1157 = vrot.lane.b32.xlu0 %v1144_v40, %s1670_s17 }
 0x4ee   : > { %v1594_v33 = vpop.eup %1593  ;;  %v854_v42 = vmul.f32 %v1592_v36, %v2096_v63  ;;  %v1197_v26 = vpop.permute.xlu0 %1196 }
 0x4ef   : > { %v1596_v48 = vpop.eup %1595  ;;  %v672_v3 = vmul.f32 %v1594_v33, %v2109_v51 }
 0x4f0   : > { %v1598_v57 = vpop.eup %1597  ;;  %v866_v59 = vsel %vm362_vm2, %v673_v50, %v854_v42  ;;  %v675_v5 = vmul.f32 %v1596_v48, %v2117_v53 }
 0x4f1   : > { %v1600_v60 = vpop.eup %1599  ;;  %1163 = vrot.lane.b32.xlu0 %v1147_v52, %s1670_s17  ;;  %1222 = vrot.lane.b32.xlu1 %v866_v59, %s1673_s10  ;;  %v865_v63 = vsel %vm362_vm2, %v672_v3, %v853_v49  ;;  %v855_v15 = vmul.f32 %v1598_v57, %v2078_v24  ;;  %s329_s17 = sand.u32 1, %s1657_s28  }
 0x4f2   : > { %v856_v47 = vmul.f32 %v1600_v60, %v2101_v28  ;;  %v1602_v7 = vpop.eup %1601  ;;  %v1195_v28 = vpop.permute.xlu1 %1194  ;;  %s1446_s18 = smul.u32 48, %s329_s17  ;;  %s2270_s25 = scalar_lea.sflag [#allocation3], %s329_s17 }
 0x4f3   : > { %v674_v54 = vmul.f32 %v1602_v7, %v2127_v23  ;;  %v1201_v46 = vpop.permute.xlu0 %1200 }
 0x4f4   : > { %v868_v10 = vsel %vm362_vm2, %v675_v5, %v856_v47  ;;  %s2223_s19 = scalar_lea.vmem [#allocation2], %s1446_s18 }
 0x4f5   : > { %1220 = vrot.lane.b32.xlu0 %v865_v63, %s1673_s10  ;;  %1226 = vrot.lane.b32.xlu1 %v868_v10, %s1673_s10  ;;  %v867_v51 = vsel %vm362_vm2, %v674_v54, %v855_v15  ;;  %s1274_s21 = sshll.u32 %s2223_s19, 4  ;;  %s2256_s21 = int_to_ptr.vmem [resolvable:$true] %s1274_s21 }
 0x4f6   : > { %v1199_v53 = vpop.permute.xlu1 %1198  ;;  %s1603_s20 = scalar_lea.vmem %s2256_s21, 768 }
 0x4f7   : > { %p1604_p11 = scmp.ne.s32.totalorder %s2256_s21, %s1603_s20 }
 0x4f9   : > { %1224 = vrot.lane.b32.xlu0 %v867_v51, %s1673_s10  ;;  %p1605_p12 = pnand %p1604_p11, %p1760_p5  ;;  %s1607_s10 = sshll.u32 %s1674_s26, 4  ;;  %s1608_s10 = int_to_ptr.vmem [resolvable:$false] %s1607_s10 }
 0x4fa   : > { %v1203_v18 = vpop.permute.xlu1 %1202  ;;  %s1609_s12 = scalar_lea.vmem %s1608_s10, 1536  ;;  %p1610_p0 = scmp.lt.s32.totalorder %s2256_s21, %s1608_s10 }
 0x4fb   : > { %p1606_p13 = pneg %p1605_p12  ;;  %p1611_p1 = scmp.lt.s32.totalorder %s1609_s12, %s1603_s20 }
 0x4fd   : > { %p1612_p2 = por %p1611_p1, %p1610_p0 }
 0x4ff   : > { %p1613_p3 = pnand %p1612_p2, %p1606_p13 }
 0x54a   : > { %v1219_v22 = vpop.permute.xlu1 %1218 }
 0x54e   : > { %v1156_v32 = vpop.permute.xlu1 %1155 }
 0x54f   : > { %v1173_v24 = vadd.f32 %v1156_v32, %v2131_v30 }
 0x551   : > { %v1186_v23 = vadd.f32 %v1377_v25, %v1173_v24 }
 0x552   : > { %v1160_v12 = vpop.permute.xlu1 %1159 }
 0x553   : > { %v1234_v8 = vsel %vm362_vm2, %v1186_v23, %v1193_v21  ;;  %v1175_v30 = vadd.f32 %v1160_v12, %v2151_v58 }
 0x554   : > { %v1240_v55 = vsel %vm1030_vm6, %v1234_v8, %v1838_v14 }
 0x556   : > { %v1162_v41 = vpop.permute.xlu1 %1161 }
 0x557   : > { %v1176_v16 = vadd.f32 %v1162_v41, %v2153_v61  ;;  %v1188_v61 = vadd.f32 %v1377_v25, %v1175_v30 }
 0x559   : > { %v1189_v62 = vadd.f32 %v1377_v25, %v1176_v16  ;;  %v1236_v11 = vsel %vm362_vm2, %v1188_v61, %v1197_v26 }
 0x55a   : > { %v1166_v29 = vpop.permute.xlu1 %1165 }
 0x55b   : > { %v1217_v56 = vpop.permute.xlu0 %1216  ;;  %v1178_v1 = vadd.f32 %v1166_v29, %v2159_v6  ;;  %v1237_v14 = vsel %vm362_vm2, %v1189_v62, %v1199_v53 }
 0x55c   : > { %v1247_v0 = vsel %vm1246_vm7, %v1240_v55, %v1217_v56  ;;  %v1243_v6 = vsel %vm1030_vm6, %v1237_v14, %v1857_v35 }
 0x55d   : > { %1254 = vst.msk [vmem:[%s2223_s19] sm:$0xff] %vm1253_vm8, %v1247_v0  ;;  %v1191_v2 = vadd.f32 %v1377_v25, %v1178_v1 }
 0x55f   : > { %v1158_v34 = vpop.permute.xlu0 %1157 }
 0x560   : > { %v1174_v58 = vadd.f32 %v1158_v34, %v2133_v31  ;;  %v1239_v31 = vsel %vm362_vm2, %v1191_v2, %v1203_v18 }
 0x561   : > { %v1245_v36 = vsel %vm1030_vm6, %v1239_v31, %v1874_v43 }
 0x562   : > { %v1187_v17 = vadd.f32 %v1377_v25, %v1174_v58 }
 0x563   : > { %v1164_v13 = vpop.permute.xlu0 %1163  ;;  %v1223_v37 = vpop.permute.xlu1 %1222 }
 0x564   : > { %v1235_v38 = vsel %vm362_vm2, %v1187_v17, %v1195_v28  ;;  %v1177_v39 = vadd.f32 %v1164_v13, %v2157_v4  ;;  %v1250_v9 = vsel %vm1246_vm7, %v1243_v6, %v1223_v37  ;;  %v1242_v4 = vsel %vm1030_vm6, %v1236_v11, %v1850_v27 }
 0x565   : > { %v1241_v40 = vsel %vm1030_vm6, %v1235_v38, %v1843_v20  ;;  %1257 = vst.msk [vmem:[%s2223_s19 + $0x18] sm:$0xff] %vm1253_vm8, %v1250_v9 }
 0x566   : > { %v1248_v35 = vsel %vm1246_vm7, %v1241_v40, %v1219_v22  ;;  %v1190_v19 = vadd.f32 %v1377_v25, %v1177_v39 }
 0x567   : > { %1255 = vst.msk [vmem:[%s2223_s19 + $0x8] sm:$0xff] %vm1253_vm8, %v1248_v35  ;;  %v1221_v45 = vpop.permute.xlu0 %1220  ;;  %v1227_v33 = vpop.permute.xlu1 %1226 }
 0x568   : > { %v1249_v20 = vsel %vm1246_vm7, %v1242_v4, %v1221_v45  ;;  %v1252_v50 = vsel %vm1246_vm7, %v1245_v36, %v1227_v33  ;;  %v1238_v42 = vsel %vm362_vm2, %v1190_v19, %v1201_v46 }
 0x569   : > { %1256 = vst.msk [vmem:[%s2223_s19 + $0x10] sm:$0xff] %vm1253_vm8, %v1249_v20  ;;  %1259 = vst.msk [vmem:[%s2223_s19 + $0x28] sm:$0xff] %vm1253_vm8, %v1252_v50  ;;  %v1244_v27 = vsel %vm1030_vm6, %v1238_v42, %v1868_v44 }
 0x56b   : > { %v1225_v43 = vpop.permute.xlu0 %1224 }
 0x56c   : > { %v1251_v48 = vsel %vm1246_vm7, %v1244_v27, %v1225_v43 }
 0x56d   : > { %1258 = vst.msk [vmem:[%s2223_s19 + $0x20] sm:$0xff] %vm1253_vm8, %v1251_v48 }
 0x56e   : > { %1616 = shalt.err (!%p1613_p3)
}
 0x56f   : > { %s1617_s13 = scalar_lea.hbm %s2263_s24, 768  ;;  %s1621_s19 = scalar_lea.hbm %s2319_s8, 1536 }
 0x570   : > { %p1618_p4 = scmp.ne.s32.totalorder %s2263_s24, %s1617_s13  ;;  %p1622_p9 = scmp.lt.u32.totalorder %s2263_s24, %s2319_s8 }
 0x571   : > { %p1623_p10 = scmp.lt.u32.totalorder %s1621_s19, %s1617_s13  ;;  %p1625_p12 = scmp.lt.u32.totalorder %s1617_s13, %s2263_s24 }
 0x572   : > { %p1619_p7 = pnand %p1618_p4, %p1760_p5 }
 0x573   : > { %p1624_p11 = por %p1623_p10, %p1622_p9 }
 0x574   : > { %p1620_p8 = pneg %p1619_p7 }
 0x575   : > { %p1626_p13 = por %p1625_p12, %p1624_p11 }
 0x577   : > { %p1627_p0 = pnand %p1626_p13, %p1620_p8 }
 0x579   : > { %1630 = shalt.err (!%p1627_p0)
}
 0x57a   : > { %s1675_s23 = smov 128   ;;  %s1676_s20 = smov 8  }
 0x57b   : > { %1447 = dma.vmem_to_hbm [thread:$0]  (%p1760_p5), %s2256_s21, 768, %s2263_s24, %s2270_s25, %s1675_s23, %s1675_s23, %s1676_s20  }
 0x57c PF: > { %p1453_p1 = scmp.ge.s32.totalorder %s1665_s30, 2  ;;  %s1289_s26 = sand.u32 1, %s1653_s27  }
 0x57d   : > { %s1290_s10 = scalar_lea.sflag [#allocation3], %s1289_s26 }
 0x57e   : > { %p1450_p2 = pnand %p1453_p1, %p1764_p6 }
 0x580   : > { %1648 = dma.done.wait (!%p1450_p2), %s1290_s10, 768  }
 0x581   : > { %1650 = vsyncadd (!%p1450_p2), %s1290_s10, 4294966528  ;;  %p18_p3 = scmp.ge.s32.totalorder %s1747_s11, 4   ;;  %s2322_s27 = smov %s1657_s28 }
 0x582   : > { %s2323_s28 = smov %s1661_s29  ;;  %s2324_s29 = smov %s1758_s14 }
 0x583   : > { %s2325_s30 = smov %s1747_s11  ;;  %20 = sbr.rel (!%p18_p3) target bundleno = 3 (0x3), region = 93 }
 0x58a   :  { %1295 = vsyncpa [#allocation3], 1 }
 0x58b   :  { %1297 = vsyncpa [#allocation3 + $0x1], 1 }

</bundles_post_ra>
